<compile_context>
chip_gen: v6e
topology: v6e:2x2x1
jax: 0.10.0
libtpu: 0.0.40
codegen_flags: <defaults>
</compile_context>

<pallas_src>
import jax
import jax.numpy as jnp
from jax.experimental import pallas as pl
from jax.experimental.pallas import tpu as pltpu

B, T, TP, E, H = 2, 16, 8, 128, 4      # batch, query time, reference time, emb dim, heads
HD = E // H                             # head dim
GN_EPS = 1e-8                           # matches nn.GroupNorm(1, emb_dim, 1e-08)


# ----------------------------------------------------------------------------
# Fused kernel: cross-attention -> FiLM -> GroupNorm -> lm linear -> reg loss
# Single grid-less invocation; activations flattened to [B*T, E].
# ----------------------------------------------------------------------------
def fused_forward_kernel(x_ref, r_ref, c_ref, w_ref, b_ref,
                         out_ref, loss_ref, ctx_ref):
    x = x_ref[...]                                   # [B*T, E]  f32  query stream (emb)
    r_bf = r_ref[...].astype(jnp.bfloat16)           # [B*TP, E] bf16 key/value stream (regi)
    x_bf = x.astype(jnp.bfloat16)

    # packed weight slab [E, 6E] (bf16) / bias slab [1, 6E] (f32), static lane slices
    wq   = w_ref[:, 0:E]                             # 1/sqrt(HD) pre-folded in
    w_kv = w_ref[:, E:3 * E]                         # [E, 2E]  (wk | wv)
    w_gb = w_ref[:, 3 * E:5 * E]                     # [E, 2E]  (wo@wg | wo@wb)
    w_lm = w_ref[:, 5 * E:6 * E]                     # [E, E]   gn_w-scaled lm weight
    bq   = b_ref[:, 0:E]
    b_kv = b_ref[:, E:3 * E]
    b_gb = b_ref[:, 3 * E:5 * E]
    b_lm = b_ref[:, 5 * E:6 * E]

    # --- self.fusion: multi-head cross attention (take output[0]) ---
    # q already includes the 1/sqrt(HD) scale via the host-side fold.
    q_bf = (jnp.dot(x_bf, wq, preferred_element_type=jnp.float32)
            + bq).astype(jnp.bfloat16)                                     # [B*T, E]
    kv = jnp.dot(r_bf, w_kv, preferred_element_type=jnp.float32) + b_kv    # [B*TP, 2E]
    k_bf = kv[:, :E].astype(jnp.bfloat16)
    v_bf = kv[:, E:].astype(jnp.bfloat16)

    for b in range(B):                               # static, unrolled (B=2)
        qs = slice(b * T, (b + 1) * T)
        ks = slice(b * TP, (b + 1) * TP)
        for h in range(H):                           # static, unrolled head loop (H=4)
            hs = slice(h * HD, (h + 1) * HD)
            qh = q_bf[qs, hs]                        # [T, HD]  bf16
            kh = k_bf[ks, hs]                        # [TP, HD] bf16
            vh = v_bf[ks, hs]                        # [TP, HD] bf16
            s = jax.lax.dot_general(qh, kh, (((1,), (1,)), ((), ())),
                                    preferred_element_type=jnp.float32)    # [T, TP] f32
            s = s - jnp.max(s, axis=-1, keepdims=True)
            p = jnp.exp(s)
            p = p * pl.reciprocal(jnp.sum(p, axis=-1, keepdims=True), approx=True)
            # this head's context at a static (row, lane) offset (no concatenate)
            ctx_ref[qs, hs] = jnp.dot(
                p.astype(jnp.bfloat16), vh,
                preferred_element_type=jnp.float32).astype(jnp.bfloat16)
    attn = ctx_ref[...]                              # [B*T, E] bf16 (pre-wo ctx; wo folded away)

    # --- self.film(emb, aux): gamma/beta in one N=2E matmul (wo pre-composed in) ---
    gb = jnp.dot(attn, w_gb, preferred_element_type=jnp.float32) + b_gb    # [B*T, 2E]
    gamma = gb[:, :E]
    beta = gb[:, E:]
    y = x * gamma + beta                             # [B*T, E] f32

    # --- self.fusion_norm: GroupNorm(1, E, eps=1e-8) over (E, T) per sample ---
    # one-pass statistics per batch element (var = E[y^2] - mu^2, clamped >= 0)
    inv_n = 1.0 / float(T * E)
    stats = []
    for b in range(B):
        yb = y[b * T:(b + 1) * T, :]
        s1 = jnp.sum(yb)
        s2 = jnp.sum(yb * yb)
        mu = s1 * inv_n
        var = jnp.maximum(s2 * inv_n - mu * mu, 0.0)
        stats.append((mu, jax.lax.rsqrt(var + GN_EPS)))
    row = jax.lax.broadcasted_iota(jnp.int32, (B * T, 1), 0)
    mu_rows = jnp.zeros((B * T, 1), jnp.float32) + stats[0][0]
    rstd_rows = jnp.zeros((B * T, 1), jnp.float32) + stats[0][1]
    for b in range(1, B):
        sel = row >= b * T
        mu_rows = jnp.where(sel, stats[b][0], mu_rows)
        rstd_rows = jnp.where(sel, stats[b][1], rstd_rows)
    y_n = (y - mu_rows) * rstd_rows                  # affine folded into lm weights

    # --- self.lm (linear stand-in, GroupNorm affine pre-composed); mlp_back = Identity ---
    out = jnp.dot(y_n.astype(jnp.bfloat16), w_lm,
                  preferred_element_type=jnp.float32) + b_lm
    out_ref[...] = out

    # --- calc_reg_loss fully in-kernel: 0.5 * L1 + 0.5 * (0.5 * MSE) ---
    diff = out - c_ref[...]
    inv_total = 1.0 / float(B * T * E)
    l1 = jnp.sum(jnp.abs(diff)) * inv_total
    l2 = 0.5 * (jnp.sum(diff * diff) * inv_total)
    loss_ref[...] = (0.5 * l1 + 0.5 * l2).reshape(1, 1)


# ----------------------------------------------------------------------------
# Host-side parameter composition (exact linear algebra in f32, then cast to bf16)
# ----------------------------------------------------------------------------
def _compose_params(p):
    hp = jax.lax.Precision.HIGHEST
    mm = lambda a, b: jnp.matmul(a, b, precision=hp)
    scale = 1.0 / (HD ** 0.5)
    wq_s = p["wq"] * scale                           # fold attention scale into q projection
    bq_s = p["bq"] * scale
    wog = mm(p["wo"], p["wg"])                       # fold wo into FiLM gamma
    wob = mm(p["wo"], p["wb"])                       # fold wo into FiLM beta
    bog = mm(p["bo"], p["wg"]) + p["bg"]
    bob = mm(p["bo"], p["wb"]) + p["bb"]
    w_lm = p["gn_w"].reshape(E, 1) * p["lm_w"]       # fold GroupNorm affine into lm
    b_lm = mm(p["gn_b"], p["lm_w"]) + p["lm_b"]
    w_all = jnp.concatenate([wq_s, p["wk"], p["wv"], wog, wob, w_lm], axis=1)   # [E, 6E]
    b_all = jnp.concatenate([bq_s, p["bk"], p["bv"], bog, bob, b_lm], axis=1)   # [1, 6E]
    return w_all.astype(jnp.bfloat16), b_all.astype(jnp.float32)


def reference_cross_attention_forward(discrete, clean, regi, p):
    """Returns (loss, aux) like the PyTorch forward (lm_first=False, clean != None)."""
    w_all, b_all = _compose_params(p)
    # Flatten batch/time on the host (free reshapes) so the kernel sees clean 2-D slabs.
    x2 = discrete.reshape(B * T, E)
    r2 = regi.reshape(B * TP, E)
    c2 = clean.reshape(B * T, E)

    aux2, loss_arr = pl.pallas_call(
        fused_forward_kernel,
        out_shape=(
            jax.ShapeDtypeStruct((B * T, E), jnp.float32),   # aux (flattened)
            jax.ShapeDtypeStruct((1, 1), jnp.float32),       # fused reg loss
        ),
        in_specs=[
            pl.BlockSpec(memory_space=pltpu.MemorySpace.VMEM),   # discrete (emb)   [B*T, E]
            pl.BlockSpec(memory_space=pltpu.MemorySpace.VMEM),   # regi             [B*TP, E]
            pl.BlockSpec(memory_space=pltpu.MemorySpace.VMEM),   # clean            [B*T, E]
            pl.BlockSpec(memory_space=pltpu.MemorySpace.VMEM),   # packed weights   [E, 6E] bf16
            pl.BlockSpec(memory_space=pltpu.MemorySpace.VMEM),   # packed biases    [1, 6E] f32
        ],
        out_specs=(
            pl.BlockSpec(memory_space=pltpu.MemorySpace.VMEM),
            pl.BlockSpec(memory_space=pltpu.MemorySpace.VMEM),
        ),
        scratch_shapes=[pltpu.VMEM((B * T, E), jnp.bfloat16)],   # per-head context buffer
    )(x2, r2, c2, w_all, b_all)

    return loss_arr[0, 0], aux2.reshape(B, T, E)


# ----------------------------------------------------------------------------
# Plain-JAX f32 reference (un-composed weights) for validation
# ----------------------------------------------------------------------------
def _ref_forward(discrete, clean, regi, p):
    hp = jax.lax.Precision.HIGHEST
    mm = lambda a, b: jnp.matmul(a, b, precision=hp)

    def split_heads(z):  # [B, L, E] -> [B, H, L, HD]
        Bz, L, _ = z.shape
        return z.reshape(Bz, L, H, HD).transpose(0, 2, 1, 3)

    x, r = discrete, regi
    q = split_heads(mm(x, p["wq"]) + p["bq"])
    k = split_heads(mm(r, p["wk"]) + p["bk"])
    v = split_heads(mm(r, p["wv"]) + p["bv"])
    s = jnp.einsum("bhtd,bhsd->bhts", q, k, precision=hp) * (1.0 / (HD ** 0.5))
    pw = jax.nn.softmax(s, axis=-1)
    attn = jnp.einsum("bhts,bhsd->bhtd", pw, v, precision=hp)
    attn = attn.transpose(0, 2, 1, 3).reshape(x.shape[0], T, E)
    attn = mm(attn, p["wo"]) + p["bo"]
    gamma = mm(attn, p["wg"]) + p["bg"]
    beta = mm(attn, p["wb"]) + p["bb"]
    y = x * gamma + beta
    mu = jnp.mean(y, axis=(1, 2), keepdims=True)
    var = jnp.mean((y - mu) ** 2, axis=(1, 2), keepdims=True)
    y = (y - mu) / jnp.sqrt(var + GN_EPS)
    y = y * p["gn_w"] + p["gn_b"]
    out = mm(y, p["lm_w"]) + p["lm_b"]
    l1 = jnp.mean(jnp.abs(out - clean))
    l2 = 0.5 * jnp.mean((out - clean) ** 2)
    return 0.5 * l1 + 0.5 * l2, out


def init_params(key):
    ks = jax.random.split(key, 16)
    w = lambda k, shape, s=0.05: (s * jax.random.normal(k, shape)).astype(jnp.float32)
    return {
        "wq": w(ks[0], (E, E)), "bq": w(ks[1], (1, E)),
        "wk": w(ks[2], (E, E)), "bk": w(ks[3], (1, E)),
        "wv": w(ks[4], (E, E)), "bv": w(ks[5], (1, E)),
        "wo": w(ks[6], (E, E)), "bo": w(ks[7], (1, E)),
        "wg": w(ks[8], (E, E)), "bg": w(ks[9], (1, E)),
        "wb": w(ks[10], (E, E)), "bb": w(ks[11], (1, E)),
        # non-trivial GroupNorm affine so the host-side folding is actually exercised
        "gn_w": (1.0 + 0.1 * jax.random.normal(ks[14], (1, E))).astype(jnp.float32),
        "gn_b": w(ks[15], (1, E)),
        "lm_w": w(ks[12], (E, E)), "lm_b": w(ks[13], (1, E)),
    }


if __name__ == "__main__":
    key = jax.random.PRNGKey(0)
    k_d, k_c, k_r, k_p = jax.random.split(key, 4)
    discrete = jax.random.normal(k_d, (B, T, E), dtype=jnp.float32)   # [B, T, E]
    clean = jax.random.normal(k_c, (B, T, E), dtype=jnp.float32)      # [B, T, E]
    regi = jax.random.normal(k_r, (B, TP, E), dtype=jnp.float32)      # [B, T', E]
    params = init_params(k_p)

    loss, aux = reference_cross_attention_forward(discrete, clean, regi, params)
    jax.block_until_ready((loss, aux))

    ref_loss, ref_aux = _ref_forward(discrete, clean, regi, params)
    assert aux.shape == (B, T, E) and loss.shape == ()
    # bf16 matmul operands (f32 accumulation) vs an exact-f32 reference -> ~1e-3 level
    # per-element drift; 2e-2 tolerance covers it with comfortable margin.
    assert jnp.allclose(aux, ref_aux, rtol=2e-2, atol=2e-2), float(jnp.max(jnp.abs(aux - ref_aux)))
    assert jnp.allclose(loss, ref_loss, rtol=2e-2, atol=2e-2), (float(loss), float(ref_loss))
    print("KERNEL_OK")
</pallas_src>

<mosaic_0001>
module attributes {stable_mosaic.version = 11 : i64} {
  func.func @fused_forward_kernel(%arg0: memref<32x128xf32, #tpu.memory_space<vmem>>, %arg1: memref<16x128xf32, #tpu.memory_space<vmem>>, %arg2: memref<32x128xf32, #tpu.memory_space<vmem>>, %arg3: memref<128x768xbf16, #tpu.memory_space<vmem>>, %arg4: memref<1x768xf32, #tpu.memory_space<vmem>>, %arg5: memref<32x128xf32, #tpu.memory_space<vmem>>, %arg6: memref<1x1xf32, #tpu.memory_space<vmem>>, %arg7: memref<32x128xbf16, #tpu.memory_space<vmem>>) attributes {dimension_semantics = [], scalar_prefetch = 0 : i64, scratch_operands = 1 : i64, tpu.core_type = #tpu.core_type<tc>} {
    %c0 = arith.constant 0 : index
    %c0_0 = arith.constant 0 : index
    %0 = vector.load %arg0[%c0, %c0_0] : memref<32x128xf32, #tpu.memory_space<vmem>>, vector<32x128xf32>
    %c0_1 = arith.constant 0 : index
    %c0_2 = arith.constant 0 : index
    %1 = vector.load %arg1[%c0_1, %c0_2] : memref<16x128xf32, #tpu.memory_space<vmem>>, vector<16x128xf32>
    %2 = arith.truncf %1 : vector<16x128xf32> to vector<16x128xbf16>
    %3 = arith.truncf %0 : vector<32x128xf32> to vector<32x128xbf16>
    %c0_3 = arith.constant 0 : index
    %c0_4 = arith.constant 0 : index
    %4 = vector.load %arg3[%c0_3, %c0_4] : memref<128x768xbf16, #tpu.memory_space<vmem>>, vector<128x128xbf16>
    %c0_5 = arith.constant 0 : index
    %c128 = arith.constant 128 : index
    %5 = vector.load %arg3[%c0_5, %c128] : memref<128x768xbf16, #tpu.memory_space<vmem>>, vector<128x256xbf16>
    %c0_6 = arith.constant 0 : index
    %c384 = arith.constant 384 : index
    %6 = vector.load %arg3[%c0_6, %c384] : memref<128x768xbf16, #tpu.memory_space<vmem>>, vector<128x256xbf16>
    %c0_7 = arith.constant 0 : index
    %c640 = arith.constant 640 : index
    %7 = vector.load %arg3[%c0_7, %c640] : memref<128x768xbf16, #tpu.memory_space<vmem>>, vector<128x128xbf16>
    %c0_8 = arith.constant 0 : index
    %c0_9 = arith.constant 0 : index
    %8 = vector.load %arg4[%c0_8, %c0_9] : memref<1x768xf32, #tpu.memory_space<vmem>>, vector<1x128xf32>
    %c0_10 = arith.constant 0 : index
    %c128_11 = arith.constant 128 : index
    %9 = vector.load %arg4[%c0_10, %c128_11] : memref<1x768xf32, #tpu.memory_space<vmem>>, vector<1x256xf32>
    %c0_12 = arith.constant 0 : index
    %c384_13 = arith.constant 384 : index
    %10 = vector.load %arg4[%c0_12, %c384_13] : memref<1x768xf32, #tpu.memory_space<vmem>>, vector<1x256xf32>
    %c0_14 = arith.constant 0 : index
    %c640_15 = arith.constant 640 : index
    %11 = vector.load %arg4[%c0_14, %c640_15] : memref<1x768xf32, #tpu.memory_space<vmem>>, vector<1x128xf32>
    %cst = arith.constant dense<0.000000e+00> : vector<32x128xf32>
    %12 = tpu.matmul %3, %4, %cst {dimension_numbers = #tpu.dot_dimension_numbers<[1], [0], [0], [1], [0, 0, 1, 1], [], []>} : vector<32x128xbf16>, vector<128x128xbf16>, vector<32x128xf32> -> vector<32x128xf32>
    %13 = vector.broadcast %8 : vector<1x128xf32> to vector<32x128xf32>
    %14 = arith.addf %12, %13 : vector<32x128xf32>
    %15 = arith.truncf %14 : vector<32x128xf32> to vector<32x128xbf16>
    %cst_16 = arith.constant dense<0.000000e+00> : vector<16x256xf32>
    %16 = tpu.matmul %2, %5, %cst_16 {dimension_numbers = #tpu.dot_dimension_numbers<[1], [0], [0], [1], [0, 0, 1, 1], [], []>} : vector<16x128xbf16>, vector<128x256xbf16>, vector<16x256xf32> -> vector<16x256xf32>
    %17 = vector.broadcast %9 : vector<1x256xf32> to vector<16x256xf32>
    %18 = arith.addf %16, %17 : vector<16x256xf32>
    %19 = vector.extract_strided_slice %18 {offsets = [0, 0], sizes = [16, 128], strides = [1, 1]} : vector<16x256xf32> to vector<16x128xf32>
    %20 = arith.truncf %19 : vector<16x128xf32> to vector<16x128xbf16>
    %21 = vector.extract_strided_slice %18 {offsets = [0, 128], sizes = [16, 128], strides = [1, 1]} : vector<16x256xf32> to vector<16x128xf32>
    %22 = arith.truncf %21 : vector<16x128xf32> to vector<16x128xbf16>
    %23 = vector.extract_strided_slice %15 {offsets = [0, 0], sizes = [16, 32], strides = [1, 1]} : vector<32x128xbf16> to vector<16x32xbf16>
    %24 = vector.extract_strided_slice %20 {offsets = [0, 0], sizes = [8, 32], strides = [1, 1]} : vector<16x128xbf16> to vector<8x32xbf16>
    %25 = vector.extract_strided_slice %22 {offsets = [0, 0], sizes = [8, 32], strides = [1, 1]} : vector<16x128xbf16> to vector<8x32xbf16>
    %cst_17 = arith.constant dense<0.000000e+00> : vector<16x8xf32>
    %26 = tpu.matmul %23, %24, %cst_17 {dimension_numbers = #tpu.dot_dimension_numbers<[1], [1], [0], [0], [0, 0, 1, 0], [], []>} : vector<16x32xbf16>, vector<8x32xbf16>, vector<16x8xf32> -> vector<16x8xf32>
    %cst_18 = arith.constant dense<0xFF800000> : vector<16xf32>
    %27 = vector.multi_reduction <maximumf>, %26, %cst_18 [1] : vector<16x8xf32> to vector<16xf32>
    %28 = vector.shape_cast %27 : vector<16xf32> to vector<16x1xf32>
    %29 = vector.broadcast %28 : vector<16x1xf32> to vector<16x8xf32>
    %30 = arith.subf %26, %29 : vector<16x8xf32>
    %31 = math.exp %30 : vector<16x8xf32>
    %cst_19 = arith.constant dense<0.000000e+00> : vector<16xf32>
    %32 = vector.multi_reduction <add>, %31, %cst_19 [1] : vector<16x8xf32> to vector<16xf32>
    %33 = vector.shape_cast %32 : vector<16xf32> to vector<16x1xf32>
    %34 = tpu.reciprocal %33 {approx = true} : vector<16x1xf32> -> vector<16x1xf32>
    %35 = vector.broadcast %34 : vector<16x1xf32> to vector<16x8xf32>
    %36 = arith.mulf %31, %35 : vector<16x8xf32>
    %37 = arith.truncf %36 : vector<16x8xf32> to vector<16x8xbf16>
    %cst_20 = arith.constant dense<0.000000e+00> : vector<16x32xf32>
    %38 = tpu.matmul %37, %25, %cst_20 {dimension_numbers = #tpu.dot_dimension_numbers<[1], [0], [0], [1], [0, 0, 1, 1], [], []>} : vector<16x8xbf16>, vector<8x32xbf16>, vector<16x32xf32> -> vector<16x32xf32>
    %39 = arith.truncf %38 : vector<16x32xf32> to vector<16x32xbf16>
    %c0_21 = arith.constant 0 : index
    %c0_22 = arith.constant 0 : index
    %40 = vector.load %arg7[%c0_21, %c0_22] : memref<32x128xbf16, #tpu.memory_space<vmem>>, vector<16x32xbf16>
    tpu.vector_store %arg7[%c0_21, %c0_22], %39 {strides = array<i32>} : memref<32x128xbf16, #tpu.memory_space<vmem>>, vector<16x32xbf16>,
    %41 = vector.extract_strided_slice %15 {offsets = [0, 32], sizes = [16, 32], strides = [1, 1]} : vector<32x128xbf16> to vector<16x32xbf16>
    %42 = vector.extract_strided_slice %20 {offsets = [0, 32], sizes = [8, 32], strides = [1, 1]} : vector<16x128xbf16> to vector<8x32xbf16>
    %43 = vector.extract_strided_slice %22 {offsets = [0, 32], sizes = [8, 32], strides = [1, 1]} : vector<16x128xbf16> to vector<8x32xbf16>
    %cst_23 = arith.constant dense<0.000000e+00> : vector<16x8xf32>
    %44 = tpu.matmul %41, %42, %cst_23 {dimension_numbers = #tpu.dot_dimension_numbers<[1], [1], [0], [0], [0, 0, 1, 0], [], []>} : vector<16x32xbf16>, vector<8x32xbf16>, vector<16x8xf32> -> vector<16x8xf32>
    %cst_24 = arith.constant dense<0xFF800000> : vector<16xf32>
    %45 = vector.multi_reduction <maximumf>, %44, %cst_24 [1] : vector<16x8xf32> to vector<16xf32>
    %46 = vector.shape_cast %45 : vector<16xf32> to vector<16x1xf32>
    %47 = vector.broadcast %46 : vector<16x1xf32> to vector<16x8xf32>
    %48 = arith.subf %44, %47 : vector<16x8xf32>
    %49 = math.exp %48 : vector<16x8xf32>
    %cst_25 = arith.constant dense<0.000000e+00> : vector<16xf32>
    %50 = vector.multi_reduction <add>, %49, %cst_25 [1] : vector<16x8xf32> to vector<16xf32>
    %51 = vector.shape_cast %50 : vector<16xf32> to vector<16x1xf32>
    %52 = tpu.reciprocal %51 {approx = true} : vector<16x1xf32> -> vector<16x1xf32>
    %53 = vector.broadcast %52 : vector<16x1xf32> to vector<16x8xf32>
    %54 = arith.mulf %49, %53 : vector<16x8xf32>
    %55 = arith.truncf %54 : vector<16x8xf32> to vector<16x8xbf16>
    %cst_26 = arith.constant dense<0.000000e+00> : vector<16x32xf32>
    %56 = tpu.matmul %55, %43, %cst_26 {dimension_numbers = #tpu.dot_dimension_numbers<[1], [0], [0], [1], [0, 0, 1, 1], [], []>} : vector<16x8xbf16>, vector<8x32xbf16>, vector<16x32xf32> -> vector<16x32xf32>
    %57 = arith.truncf %56 : vector<16x32xf32> to vector<16x32xbf16>
    %c0_27 = arith.constant 0 : index
    %c32 = arith.constant 32 : index
    %58 = vector.load %arg7[%c0_27, %c32] : memref<32x128xbf16, #tpu.memory_space<vmem>>, vector<16x32xbf16>
    tpu.vector_store %arg7[%c0_27, %c32], %57 {strides = array<i32>} : memref<32x128xbf16, #tpu.memory_space<vmem>>, vector<16x32xbf16>,
    %59 = vector.extract_strided_slice %15 {offsets = [0, 64], sizes = [16, 32], strides = [1, 1]} : vector<32x128xbf16> to vector<16x32xbf16>
    %60 = vector.extract_strided_slice %20 {offsets = [0, 64], sizes = [8, 32], strides = [1, 1]} : vector<16x128xbf16> to vector<8x32xbf16>
    %61 = vector.extract_strided_slice %22 {offsets = [0, 64], sizes = [8, 32], strides = [1, 1]} : vector<16x128xbf16> to vector<8x32xbf16>
    %cst_28 = arith.constant dense<0.000000e+00> : vector<16x8xf32>
    %62 = tpu.matmul %59, %60, %cst_28 {dimension_numbers = #tpu.dot_dimension_numbers<[1], [1], [0], [0], [0, 0, 1, 0], [], []>} : vector<16x32xbf16>, vector<8x32xbf16>, vector<16x8xf32> -> vector<16x8xf32>
    %cst_29 = arith.constant dense<0xFF800000> : vector<16xf32>
    %63 = vector.multi_reduction <maximumf>, %62, %cst_29 [1] : vector<16x8xf32> to vector<16xf32>
    %64 = vector.shape_cast %63 : vector<16xf32> to vector<16x1xf32>
    %65 = vector.broadcast %64 : vector<16x1xf32> to vector<16x8xf32>
    %66 = arith.subf %62, %65 : vector<16x8xf32>
    %67 = math.exp %66 : vector<16x8xf32>
    %cst_30 = arith.constant dense<0.000000e+00> : vector<16xf32>
    %68 = vector.multi_reduction <add>, %67, %cst_30 [1] : vector<16x8xf32> to vector<16xf32>
    %69 = vector.shape_cast %68 : vector<16xf32> to vector<16x1xf32>
    %70 = tpu.reciprocal %69 {approx = true} : vector<16x1xf32> -> vector<16x1xf32>
    %71 = vector.broadcast %70 : vector<16x1xf32> to vector<16x8xf32>
    %72 = arith.mulf %67, %71 : vector<16x8xf32>
    %73 = arith.truncf %72 : vector<16x8xf32> to vector<16x8xbf16>
    %cst_31 = arith.constant dense<0.000000e+00> : vector<16x32xf32>
    %74 = tpu.matmul %73, %61, %cst_31 {dimension_numbers = #tpu.dot_dimension_numbers<[1], [0], [0], [1], [0, 0, 1, 1], [], []>} : vector<16x8xbf16>, vector<8x32xbf16>, vector<16x32xf32> -> vector<16x32xf32>
    %75 = arith.truncf %74 : vector<16x32xf32> to vector<16x32xbf16>
    %c0_32 = arith.constant 0 : index
    %c64 = arith.constant 64 : index
    %76 = vector.load %arg7[%c0_32, %c64] : memref<32x128xbf16, #tpu.memory_space<vmem>>, vector<16x32xbf16>
    tpu.vector_store %arg7[%c0_32, %c64], %75 {strides = array<i32>} : memref<32x128xbf16, #tpu.memory_space<vmem>>, vector<16x32xbf16>,
    %77 = vector.extract_strided_slice %15 {offsets = [0, 96], sizes = [16, 32], strides = [1, 1]} : vector<32x128xbf16> to vector<16x32xbf16>
    %78 = vector.extract_strided_slice %20 {offsets = [0, 96], sizes = [8, 32], strides = [1, 1]} : vector<16x128xbf16> to vector<8x32xbf16>
    %79 = vector.extract_strided_slice %22 {offsets = [0, 96], sizes = [8, 32], strides = [1, 1]} : vector<16x128xbf16> to vector<8x32xbf16>
    %cst_33 = arith.constant dense<0.000000e+00> : vector<16x8xf32>
    %80 = tpu.matmul %77, %78, %cst_33 {dimension_numbers = #tpu.dot_dimension_numbers<[1], [1], [0], [0], [0, 0, 1, 0], [], []>} : vector<16x32xbf16>, vector<8x32xbf16>, vector<16x8xf32> -> vector<16x8xf32>
    %cst_34 = arith.constant dense<0xFF800000> : vector<16xf32>
    %81 = vector.multi_reduction <maximumf>, %80, %cst_34 [1] : vector<16x8xf32> to vector<16xf32>
    %82 = vector.shape_cast %81 : vector<16xf32> to vector<16x1xf32>
    %83 = vector.broadcast %82 : vector<16x1xf32> to vector<16x8xf32>
    %84 = arith.subf %80, %83 : vector<16x8xf32>
    %85 = math.exp %84 : vector<16x8xf32>
    %cst_35 = arith.constant dense<0.000000e+00> : vector<16xf32>
    %86 = vector.multi_reduction <add>, %85, %cst_35 [1] : vector<16x8xf32> to vector<16xf32>
    %87 = vector.shape_cast %86 : vector<16xf32> to vector<16x1xf32>
    %88 = tpu.reciprocal %87 {approx = true} : vector<16x1xf32> -> vector<16x1xf32>
    %89 = vector.broadcast %88 : vector<16x1xf32> to vector<16x8xf32>
    %90 = arith.mulf %85, %89 : vector<16x8xf32>
    %91 = arith.truncf %90 : vector<16x8xf32> to vector<16x8xbf16>
    %cst_36 = arith.constant dense<0.000000e+00> : vector<16x32xf32>
    %92 = tpu.matmul %91, %79, %cst_36 {dimension_numbers = #tpu.dot_dimension_numbers<[1], [0], [0], [1], [0, 0, 1, 1], [], []>} : vector<16x8xbf16>, vector<8x32xbf16>, vector<16x32xf32> -> vector<16x32xf32>
    %93 = arith.truncf %92 : vector<16x32xf32> to vector<16x32xbf16>
    %c0_37 = arith.constant 0 : index
    %c96 = arith.constant 96 : index
    %94 = vector.load %arg7[%c0_37, %c96] : memref<32x128xbf16, #tpu.memory_space<vmem>>, vector<16x32xbf16>
    tpu.vector_store %arg7[%c0_37, %c96], %93 {strides = array<i32>} : memref<32x128xbf16, #tpu.memory_space<vmem>>, vector<16x32xbf16>,
    %95 = vector.extract_strided_slice %15 {offsets = [16, 0], sizes = [16, 32], strides = [1, 1]} : vector<32x128xbf16> to vector<16x32xbf16>
    %96 = vector.extract_strided_slice %20 {offsets = [8, 0], sizes = [8, 32], strides = [1, 1]} : vector<16x128xbf16> to vector<8x32xbf16>
    %97 = vector.extract_strided_slice %22 {offsets = [8, 0], sizes = [8, 32], strides = [1, 1]} : vector<16x128xbf16> to vector<8x32xbf16>
    %cst_38 = arith.constant dense<0.000000e+00> : vector<16x8xf32>
    %98 = tpu.matmul %95, %96, %cst_38 {dimension_numbers = #tpu.dot_dimension_numbers<[1], [1], [0], [0], [0, 0, 1, 0], [], []>} : vector<16x32xbf16>, vector<8x32xbf16>, vector<16x8xf32> -> vector<16x8xf32>
    %cst_39 = arith.constant dense<0xFF800000> : vector<16xf32>
    %99 = vector.multi_reduction <maximumf>, %98, %cst_39 [1] : vector<16x8xf32> to vector<16xf32>
    %100 = vector.shape_cast %99 : vector<16xf32> to vector<16x1xf32>
    %101 = vector.broadcast %100 : vector<16x1xf32> to vector<16x8xf32>
    %102 = arith.subf %98, %101 : vector<16x8xf32>
    %103 = math.exp %102 : vector<16x8xf32>
    %cst_40 = arith.constant dense<0.000000e+00> : vector<16xf32>
    %104 = vector.multi_reduction <add>, %103, %cst_40 [1] : vector<16x8xf32> to vector<16xf32>
    %105 = vector.shape_cast %104 : vector<16xf32> to vector<16x1xf32>
    %106 = tpu.reciprocal %105 {approx = true} : vector<16x1xf32> -> vector<16x1xf32>
    %107 = vector.broadcast %106 : vector<16x1xf32> to vector<16x8xf32>
    %108 = arith.mulf %103, %107 : vector<16x8xf32>
    %109 = arith.truncf %108 : vector<16x8xf32> to vector<16x8xbf16>
    %cst_41 = arith.constant dense<0.000000e+00> : vector<16x32xf32>
    %110 = tpu.matmul %109, %97, %cst_41 {dimension_numbers = #tpu.dot_dimension_numbers<[1], [0], [0], [1], [0, 0, 1, 1], [], []>} : vector<16x8xbf16>, vector<8x32xbf16>, vector<16x32xf32> -> vector<16x32xf32>
    %111 = arith.truncf %110 : vector<16x32xf32> to vector<16x32xbf16>
    %c16 = arith.constant 16 : index
    %c0_42 = arith.constant 0 : index
    %112 = vector.load %arg7[%c16, %c0_42] : memref<32x128xbf16, #tpu.memory_space<vmem>>, vector<16x32xbf16>
    tpu.vector_store %arg7[%c16, %c0_42], %111 {strides = array<i32>} : memref<32x128xbf16, #tpu.memory_space<vmem>>, vector<16x32xbf16>,
    %113 = vector.extract_strided_slice %15 {offsets = [16, 32], sizes = [16, 32], strides = [1, 1]} : vector<32x128xbf16> to vector<16x32xbf16>
    %114 = vector.extract_strided_slice %20 {offsets = [8, 32], sizes = [8, 32], strides = [1, 1]} : vector<16x128xbf16> to vector<8x32xbf16>
    %115 = vector.extract_strided_slice %22 {offsets = [8, 32], sizes = [8, 32], strides = [1, 1]} : vector<16x128xbf16> to vector<8x32xbf16>
    %cst_43 = arith.constant dense<0.000000e+00> : vector<16x8xf32>
    %116 = tpu.matmul %113, %114, %cst_43 {dimension_numbers = #tpu.dot_dimension_numbers<[1], [1], [0], [0], [0, 0, 1, 0], [], []>} : vector<16x32xbf16>, vector<8x32xbf16>, vector<16x8xf32> -> vector<16x8xf32>
    %cst_44 = arith.constant dense<0xFF800000> : vector<16xf32>
    %117 = vector.multi_reduction <maximumf>, %116, %cst_44 [1] : vector<16x8xf32> to vector<16xf32>
    %118 = vector.shape_cast %117 : vector<16xf32> to vector<16x1xf32>
    %119 = vector.broadcast %118 : vector<16x1xf32> to vector<16x8xf32>
    %120 = arith.subf %116, %119 : vector<16x8xf32>
    %121 = math.exp %120 : vector<16x8xf32>
    %cst_45 = arith.constant dense<0.000000e+00> : vector<16xf32>
    %122 = vector.multi_reduction <add>, %121, %cst_45 [1] : vector<16x8xf32> to vector<16xf32>
    %123 = vector.shape_cast %122 : vector<16xf32> to vector<16x1xf32>
    %124 = tpu.reciprocal %123 {approx = true} : vector<16x1xf32> -> vector<16x1xf32>
    %125 = vector.broadcast %124 : vector<16x1xf32> to vector<16x8xf32>
    %126 = arith.mulf %121, %125 : vector<16x8xf32>
    %127 = arith.truncf %126 : vector<16x8xf32> to vector<16x8xbf16>
    %cst_46 = arith.constant dense<0.000000e+00> : vector<16x32xf32>
    %128 = tpu.matmul %127, %115, %cst_46 {dimension_numbers = #tpu.dot_dimension_numbers<[1], [0], [0], [1], [0, 0, 1, 1], [], []>} : vector<16x8xbf16>, vector<8x32xbf16>, vector<16x32xf32> -> vector<16x32xf32>
    %129 = arith.truncf %128 : vector<16x32xf32> to vector<16x32xbf16>
    %c16_47 = arith.constant 16 : index
    %c32_48 = arith.constant 32 : index
    %130 = vector.load %arg7[%c16_47, %c32_48] : memref<32x128xbf16, #tpu.memory_space<vmem>>, vector<16x32xbf16>
    tpu.vector_store %arg7[%c16_47, %c32_48], %129 {strides = array<i32>} : memref<32x128xbf16, #tpu.memory_space<vmem>>, vector<16x32xbf16>,
    %131 = vector.extract_strided_slice %15 {offsets = [16, 64], sizes = [16, 32], strides = [1, 1]} : vector<32x128xbf16> to vector<16x32xbf16>
    %132 = vector.extract_strided_slice %20 {offsets = [8, 64], sizes = [8, 32], strides = [1, 1]} : vector<16x128xbf16> to vector<8x32xbf16>
    %133 = vector.extract_strided_slice %22 {offsets = [8, 64], sizes = [8, 32], strides = [1, 1]} : vector<16x128xbf16> to vector<8x32xbf16>
    %cst_49 = arith.constant dense<0.000000e+00> : vector<16x8xf32>
    %134 = tpu.matmul %131, %132, %cst_49 {dimension_numbers = #tpu.dot_dimension_numbers<[1], [1], [0], [0], [0, 0, 1, 0], [], []>} : vector<16x32xbf16>, vector<8x32xbf16>, vector<16x8xf32> -> vector<16x8xf32>
    %cst_50 = arith.constant dense<0xFF800000> : vector<16xf32>
    %135 = vector.multi_reduction <maximumf>, %134, %cst_50 [1] : vector<16x8xf32> to vector<16xf32>
    %136 = vector.shape_cast %135 : vector<16xf32> to vector<16x1xf32>
    %137 = vector.broadcast %136 : vector<16x1xf32> to vector<16x8xf32>
    %138 = arith.subf %134, %137 : vector<16x8xf32>
    %139 = math.exp %138 : vector<16x8xf32>
    %cst_51 = arith.constant dense<0.000000e+00> : vector<16xf32>
    %140 = vector.multi_reduction <add>, %139, %cst_51 [1] : vector<16x8xf32> to vector<16xf32>
    %141 = vector.shape_cast %140 : vector<16xf32> to vector<16x1xf32>
    %142 = tpu.reciprocal %141 {approx = true} : vector<16x1xf32> -> vector<16x1xf32>
    %143 = vector.broadcast %142 : vector<16x1xf32> to vector<16x8xf32>
    %144 = arith.mulf %139, %143 : vector<16x8xf32>
    %145 = arith.truncf %144 : vector<16x8xf32> to vector<16x8xbf16>
    %cst_52 = arith.constant dense<0.000000e+00> : vector<16x32xf32>
    %146 = tpu.matmul %145, %133, %cst_52 {dimension_numbers = #tpu.dot_dimension_numbers<[1], [0], [0], [1], [0, 0, 1, 1], [], []>} : vector<16x8xbf16>, vector<8x32xbf16>, vector<16x32xf32> -> vector<16x32xf32>
    %147 = arith.truncf %146 : vector<16x32xf32> to vector<16x32xbf16>
    %c16_53 = arith.constant 16 : index
    %c64_54 = arith.constant 64 : index
    %148 = vector.load %arg7[%c16_53, %c64_54] : memref<32x128xbf16, #tpu.memory_space<vmem>>, vector<16x32xbf16>
    tpu.vector_store %arg7[%c16_53, %c64_54], %147 {strides = array<i32>} : memref<32x128xbf16, #tpu.memory_space<vmem>>, vector<16x32xbf16>,
    %149 = vector.extract_strided_slice %15 {offsets = [16, 96], sizes = [16, 32], strides = [1, 1]} : vector<32x128xbf16> to vector<16x32xbf16>
    %150 = vector.extract_strided_slice %20 {offsets = [8, 96], sizes = [8, 32], strides = [1, 1]} : vector<16x128xbf16> to vector<8x32xbf16>
    %151 = vector.extract_strided_slice %22 {offsets = [8, 96], sizes = [8, 32], strides = [1, 1]} : vector<16x128xbf16> to vector<8x32xbf16>
    %cst_55 = arith.constant dense<0.000000e+00> : vector<16x8xf32>
    %152 = tpu.matmul %149, %150, %cst_55 {dimension_numbers = #tpu.dot_dimension_numbers<[1], [1], [0], [0], [0, 0, 1, 0], [], []>} : vector<16x32xbf16>, vector<8x32xbf16>, vector<16x8xf32> -> vector<16x8xf32>
    %cst_56 = arith.constant dense<0xFF800000> : vector<16xf32>
    %153 = vector.multi_reduction <maximumf>, %152, %cst_56 [1] : vector<16x8xf32> to vector<16xf32>
    %154 = vector.shape_cast %153 : vector<16xf32> to vector<16x1xf32>
    %155 = vector.broadcast %154 : vector<16x1xf32> to vector<16x8xf32>
    %156 = arith.subf %152, %155 : vector<16x8xf32>
    %157 = math.exp %156 : vector<16x8xf32>
    %cst_57 = arith.constant dense<0.000000e+00> : vector<16xf32>
    %158 = vector.multi_reduction <add>, %157, %cst_57 [1] : vector<16x8xf32> to vector<16xf32>
    %159 = vector.shape_cast %158 : vector<16xf32> to vector<16x1xf32>
    %160 = tpu.reciprocal %159 {approx = true} : vector<16x1xf32> -> vector<16x1xf32>
    %161 = vector.broadcast %160 : vector<16x1xf32> to vector<16x8xf32>
    %162 = arith.mulf %157, %161 : vector<16x8xf32>
    %163 = arith.truncf %162 : vector<16x8xf32> to vector<16x8xbf16>
    %cst_58 = arith.constant dense<0.000000e+00> : vector<16x32xf32>
    %164 = tpu.matmul %163, %151, %cst_58 {dimension_numbers = #tpu.dot_dimension_numbers<[1], [0], [0], [1], [0, 0, 1, 1], [], []>} : vector<16x8xbf16>, vector<8x32xbf16>, vector<16x32xf32> -> vector<16x32xf32>
    %165 = arith.truncf %164 : vector<16x32xf32> to vector<16x32xbf16>
    %c16_59 = arith.constant 16 : index
    %c96_60 = arith.constant 96 : index
    %166 = vector.load %arg7[%c16_59, %c96_60] : memref<32x128xbf16, #tpu.memory_space<vmem>>, vector<16x32xbf16>
    tpu.vector_store %arg7[%c16_59, %c96_60], %165 {strides = array<i32>} : memref<32x128xbf16, #tpu.memory_space<vmem>>, vector<16x32xbf16>,
    %c0_61 = arith.constant 0 : index
    %c0_62 = arith.constant 0 : index
    %167 = vector.load %arg7[%c0_61, %c0_62] : memref<32x128xbf16, #tpu.memory_space<vmem>>, vector<32x128xbf16>
    %cst_63 = arith.constant dense<0.000000e+00> : vector<32x256xf32>
    %168 = tpu.matmul %167, %6, %cst_63 {dimension_numbers = #tpu.dot_dimension_numbers<[1], [0], [0], [1], [0, 0, 1, 1], [], []>} : vector<32x128xbf16>, vector<128x256xbf16>, vector<32x256xf32> -> vector<32x256xf32>
    %169 = vector.broadcast %10 : vector<1x256xf32> to vector<32x256xf32>
    %170 = arith.addf %168, %169 : vector<32x256xf32>
    %171 = vector.extract_strided_slice %170 {offsets = [0, 0], sizes = [32, 128], strides = [1, 1]} : vector<32x256xf32> to vector<32x128xf32>
    %172 = vector.extract_strided_slice %170 {offsets = [0, 128], sizes = [32, 128], strides = [1, 1]} : vector<32x256xf32> to vector<32x128xf32>
    %173 = arith.mulf %0, %171 : vector<32x128xf32>
    %174 = arith.addf %173, %172 : vector<32x128xf32>
    %175 = vector.extract_strided_slice %174 {offsets = [0, 0], sizes = [16, 128], strides = [1, 1]} : vector<32x128xf32> to vector<16x128xf32>
    %176 = vector.shape_cast %175 : vector<16x128xf32> to vector<1x16x128xf32>
    %cst_64 = arith.constant dense<0.000000e+00> : vector<1xf32>
    %177 = vector.multi_reduction <add>, %176, %cst_64 [1, 2] : vector<1x16x128xf32> to vector<1xf32>
    %178 = vector.shape_cast %177 : vector<1xf32> to vector<1x1x1xf32>
    %179 = vector.extract %178[0, 0, 0] : f32 from vector<1x1x1xf32>
    %180 = arith.mulf %175, %175 : vector<16x128xf32>
    %181 = vector.shape_cast %180 : vector<16x128xf32> to vector<1x16x128xf32>
    %cst_65 = arith.constant dense<0.000000e+00> : vector<1xf32>
    %182 = vector.multi_reduction <add>, %181, %cst_65 [1, 2] : vector<1x16x128xf32> to vector<1xf32>
    %183 = vector.shape_cast %182 : vector<1xf32> to vector<1x1x1xf32>
    %184 = vector.extract %183[0, 0, 0] : f32 from vector<1x1x1xf32>
    %cst_66 = arith.constant 4.8828125E-4 : f32
    %185 = arith.mulf %179, %cst_66 : f32
    %cst_67 = arith.constant 4.8828125E-4 : f32
    %186 = arith.mulf %184, %cst_67 : f32
    %187 = arith.mulf %185, %185 : f32
    %188 = arith.subf %186, %187 : f32
    %cst_68 = arith.constant 0.000000e+00 : f32
    %189 = arith.maximumf %188, %cst_68 : f32
    %cst_69 = arith.constant 9.99999993E-9 : f32
    %190 = arith.addf %189, %cst_69 : f32
    %191 = math.rsqrt %190 : f32
    %192 = vector.extract_strided_slice %174 {offsets = [16, 0], sizes = [16, 128], strides = [1, 1]} : vector<32x128xf32> to vector<16x128xf32>
    %193 = vector.shape_cast %192 : vector<16x128xf32> to vector<1x16x128xf32>
    %cst_70 = arith.constant dense<0.000000e+00> : vector<1xf32>
    %194 = vector.multi_reduction <add>, %193, %cst_70 [1, 2] : vector<1x16x128xf32> to vector<1xf32>
    %195 = vector.shape_cast %194 : vector<1xf32> to vector<1x1x1xf32>
    %196 = vector.extract %195[0, 0, 0] : f32 from vector<1x1x1xf32>
    %197 = arith.mulf %192, %192 : vector<16x128xf32>
    %198 = vector.shape_cast %197 : vector<16x128xf32> to vector<1x16x128xf32>
    %cst_71 = arith.constant dense<0.000000e+00> : vector<1xf32>
    %199 = vector.multi_reduction <add>, %198, %cst_71 [1, 2] : vector<1x16x128xf32> to vector<1xf32>
    %200 = vector.shape_cast %199 : vector<1xf32> to vector<1x1x1xf32>
    %201 = vector.extract %200[0, 0, 0] : f32 from vector<1x1x1xf32>
    %cst_72 = arith.constant 4.8828125E-4 : f32
    %202 = arith.mulf %196, %cst_72 : f32
    %cst_73 = arith.constant 4.8828125E-4 : f32
    %203 = arith.mulf %201, %cst_73 : f32
    %204 = arith.mulf %202, %202 : f32
    %205 = arith.subf %203, %204 : f32
    %cst_74 = arith.constant 0.000000e+00 : f32
    %206 = arith.maximumf %205, %cst_74 : f32
    %cst_75 = arith.constant 9.99999993E-9 : f32
    %207 = arith.addf %206, %cst_75 : f32
    %208 = math.rsqrt %207 : f32
    %209 = tpu.iota {dimensions = array<i32: 0>} : vector<32x1xi32>
    %cst_76 = arith.constant 0.000000e+00 : f32
    %210 = vector.broadcast %cst_76 : f32 to vector<32x1xf32>
    %211 = vector.broadcast %185 : f32 to vector<32x1xf32>
    %212 = arith.addf %210, %211 : vector<32x1xf32>
    %cst_77 = arith.constant 0.000000e+00 : f32
    %213 = vector.broadcast %cst_77 : f32 to vector<32x1xf32>
    %214 = vector.broadcast %191 : f32 to vector<32x1xf32>
    %215 = arith.addf %213, %214 : vector<32x1xf32>
    %c16_i32 = arith.constant 16 : i32
    %216 = vector.broadcast %c16_i32 : i32 to vector<32x1xi32>
    %217 = arith.cmpi sge, %209, %216 : vector<32x1xi32>
    %218 = vector.broadcast %202 : f32 to vector<32x1xf32>
    %219 = arith.select %217, %218, %212 : vector<32x1xi1>, vector<32x1xf32>
    %220 = vector.broadcast %208 : f32 to vector<32x1xf32>
    %221 = arith.select %217, %220, %215 : vector<32x1xi1>, vector<32x1xf32>
    %222 = vector.broadcast %219 : vector<32x1xf32> to vector<32x128xf32>
    %223 = arith.subf %174, %222 : vector<32x128xf32>
    %224 = vector.broadcast %221 : vector<32x1xf32> to vector<32x128xf32>
    %225 = arith.mulf %223, %224 : vector<32x128xf32>
    %226 = arith.truncf %225 : vector<32x128xf32> to vector<32x128xbf16>
    %cst_78 = arith.constant dense<0.000000e+00> : vector<32x128xf32>
    %227 = tpu.matmul %226, %7, %cst_78 {dimension_numbers = #tpu.dot_dimension_numbers<[1], [0], [0], [1], [0, 0, 1, 1], [], []>} : vector<32x128xbf16>, vector<128x128xbf16>, vector<32x128xf32> -> vector<32x128xf32>
    %228 = vector.broadcast %11 : vector<1x128xf32> to vector<32x128xf32>
    %229 = arith.addf %227, %228 : vector<32x128xf32>
    %c0_79 = arith.constant 0 : index
    %c0_80 = arith.constant 0 : index
    %230 = vector.load %arg5[%c0_79, %c0_80] : memref<32x128xf32, #tpu.memory_space<vmem>>, vector<32x128xf32>
    tpu.vector_store %arg5[%c0_79, %c0_80], %229 {strides = array<i32>} : memref<32x128xf32, #tpu.memory_space<vmem>>, vector<32x128xf32>,
    %c0_81 = arith.constant 0 : index
    %c0_82 = arith.constant 0 : index
    %231 = vector.load %arg2[%c0_81, %c0_82] : memref<32x128xf32, #tpu.memory_space<vmem>>, vector<32x128xf32>
    %232 = arith.subf %229, %231 : vector<32x128xf32>
    %233 = math.absf %232 : vector<32x128xf32>
    %234 = vector.shape_cast %233 : vector<32x128xf32> to vector<1x32x128xf32>
    %cst_83 = arith.constant dense<0.000000e+00> : vector<1xf32>
    %235 = vector.multi_reduction <add>, %234, %cst_83 [1, 2] : vector<1x32x128xf32> to vector<1xf32>
    %236 = vector.shape_cast %235 : vector<1xf32> to vector<1x1x1xf32>
    %237 = vector.extract %236[0, 0, 0] : f32 from vector<1x1x1xf32>
    %cst_84 = arith.constant 2.44140625E-4 : f32
    %238 = arith.mulf %237, %cst_84 : f32
    %239 = arith.mulf %232, %232 : vector<32x128xf32>
    %240 = vector.shape_cast %239 : vector<32x128xf32> to vector<1x32x128xf32>
    %cst_85 = arith.constant dense<0.000000e+00> : vector<1xf32>
    %241 = vector.multi_reduction <add>, %240, %cst_85 [1, 2] : vector<1x32x128xf32> to vector<1xf32>
    %242 = vector.shape_cast %241 : vector<1xf32> to vector<1x1x1xf32>
    %243 = vector.extract %242[0, 0, 0] : f32 from vector<1x1x1xf32>
    %cst_86 = arith.constant 2.44140625E-4 : f32
    %244 = arith.mulf %243, %cst_86 : f32
    %cst_87 = arith.constant 5.000000e-01 : f32
    %245 = arith.mulf %cst_87, %244 : f32
    %cst_88 = arith.constant 5.000000e-01 : f32
    %246 = arith.mulf %cst_88, %238 : f32
    %cst_89 = arith.constant 5.000000e-01 : f32
    %247 = arith.mulf %cst_89, %245 : f32
    %248 = arith.addf %246, %247 : f32
    %249 = vector.broadcast %248 : f32 to vector<1x1xf32>
    %c0_90 = arith.constant 0 : index
    %c0_91 = arith.constant 0 : index
    %250 = vector.load %arg6[%c0_90, %c0_91] : memref<1x1xf32, #tpu.memory_space<vmem>>, vector<1x1xf32>
    tpu.vector_store %arg6[%c0_90, %c0_91], %249 {strides = array<i32>} : memref<1x1xf32, #tpu.memory_space<vmem>>, vector<1x1xf32>,
    return
  }
}

</mosaic_0001>

<bundles_post_ra>
// kernel: tpu_custom_call.1
= control target key start
LH: loop header
LB: loop body
LE: loop exit
PB: predicated region body
PF: predicated region fallthrough
CT: control target
= control target key end

     0   :  { %12 = vsyncpa [#allocation4], 0  ;;  %s2957_s0 = inlined_call_operand.hbm [shape: f32[32,128], index: 0, kind: input, shape index: {}]   ;;  %s2958_s1 = inlined_call_operand.hbm [shape: f32[16,128], index: 1, kind: input, shape index: {}]   ;;  %s2959_s2 = inlined_call_operand.hbm [shape: f32[32,128], index: 2, kind: input, shape index: {}]   ;;  %s2960_s3 = inlined_call_operand.hbm [shape: bf16[128,768], index: 3, kind: input, shape index: {}]   ;;  %s2961_s4 = inlined_call_operand.vmem [shape: f32[1,768], index: 4, kind: input, shape index: {}]   ;;  %s2962_s5 = inlined_call_operand.hbm [shape: f32[32,128], index: 5, kind: output, shape index: {0}]   ;;  %s2963_s6 = inlined_call_operand.hbm [shape: f32[1,1], index: 6, kind: output, shape index: {1}]  }
   0x1   :  { %13 = vsyncpa [#allocation7], 0 }
   0x2   :  { %14 = vsyncpa [#allocation10], 0 }
   0x3   :  { %15 = vsyncpa [#allocation5], 0 }
   0x4   :  { %16 = vsyncpa [#allocation13], 0  ;;  %s2528_s21 = smov [#allocation6]   ;;  %s2529_s23 = smov [#allocation3]  }
   0x5   :  { %s34_s22 = sshll.u32 %s2528_s21, 4  ;;  %s22_s24 = sshll.u32 %s2529_s23, 4  ;;  %s35_s22 = int_to_ptr.vmem [resolvable:$true] %s34_s22  ;;  %s23_s24 = int_to_ptr.vmem [resolvable:$true] %s22_s24 }
   0x6   :  { %s2406_s25 = scalar_lea.vmem %s35_s22, 256  ;;  %p2411_p1 = scmp.lt.s32.totalorder %s35_s22, %s35_s22 }
   0x7   :  { %p2407_p0 = scmp.ne.s32.totalorder %s35_s22, %s2406_s25  ;;  %p2412_p2 = scmp.lt.s32.totalorder %s2406_s25, %s2406_s25 }
   0x9   :  { %p2413_p3 = por %p2412_p2, %p2411_p1 }
   0xb   :  { %p2414_p4 = pnand %p2413_p3, %p2407_p0 }
   0xd   :  { %2417 = shalt.err (!%p2414_p4)
}
   0xe   :  { %s2530_s26 = smov 128   ;;  %s2531_s27 = smov 8  }
   0xf   :  { %40 = dma.hbm_to_vmem [thread:$0]  %s2958_s1, 256, %s35_s22, [#allocation7], %s2530_s26, %s2530_s26, %s2531_s27  }
  0x10   :  { %s2426_s30 = scalar_lea.vmem %s23_s24, 512  ;;  %p2431_p6 = scmp.lt.s32.totalorder %s23_s24, %s23_s24 }
  0x11   :  { %p2427_p5 = scmp.ne.s32.totalorder %s23_s24, %s2426_s30  ;;  %p2432_p7 = scmp.lt.s32.totalorder %s2426_s30, %s2426_s30 }
  0x13   :  { %p2433_p8 = por %p2432_p7, %p2431_p6 }
  0x15   :  { %p2434_p9 = pnand %p2433_p8, %p2427_p5 }
  0x17   :  { %2437 = shalt.err (!%p2434_p9)
}
  0x18   :  { %28 = dma.hbm_to_vmem [thread:$0]  %s2957_s0, 512, %s23_s24, [#allocation4], %s2530_s26, %s2530_s26, %s2531_s27  }
  0x19   :  { %s2532_s9 = smov [#allocation8]   ;;  %s2533_s11 = smov [#allocation9]  }
  0x1a   :  { %s46_s10 = sshll.u32 %s2532_s9, 4  ;;  %s58_s12 = sshll.u32 %s2533_s11, 4  ;;  %s47_s10 = int_to_ptr.vmem [resolvable:$true] %s46_s10  ;;  %s59_s12 = int_to_ptr.vmem [resolvable:$true] %s58_s12 }
  0x1b   :  { %s2446_s1 = scalar_lea.vmem %s47_s10, 512  ;;  %p2451_p11 = scmp.lt.s32.totalorder %s47_s10, %s47_s10 }
  0x1c   :  { %p2447_p10 = scmp.ne.s32.totalorder %s47_s10, %s2446_s1  ;;  %p2452_p12 = scmp.lt.s32.totalorder %s2446_s1, %s2446_s1 }
  0x1e   :  { %p2453_p13 = por %p2452_p12, %p2451_p11 }
  0x20   :  { %p2454_p0 = pnand %p2453_p13, %p2447_p10 }
  0x22   :  { %2457 = shalt.err (!%p2454_p0)
}
  0x23   :  { %52 = dma.hbm_to_vmem [thread:$0]  %s2959_s2, 512, %s47_s10, [#allocation7], %s2530_s26, %s2530_s26, %s2531_s27  }
  0x24   :  { %s2466_s0 = scalar_lea.vmem %s59_s12, 6144  ;;  %p2471_p2 = scmp.lt.s32.totalorder %s59_s12, %s59_s12 }
  0x25   :  { %p2467_p1 = scmp.ne.s32.totalorder %s59_s12, %s2466_s0  ;;  %p2472_p3 = scmp.lt.s32.totalorder %s2466_s0, %s2466_s0 }
  0x27   :  { %p2473_p4 = por %p2472_p3, %p2471_p2 }
  0x29   :  { %p2474_p5 = pnand %p2473_p4, %p2467_p1 }
  0x2b   :  { %2477 = shalt.err (!%p2474_p5)
}
  0x2c   :  { %s2534_s15 = smov 384   ;;  %s2535_s16 = smov 24  }
  0x2d   :  { %64 = dma.hbm_to_vmem [thread:$0]  %s2960_s3, 6144, %s59_s12, [#allocation10], %s2534_s15, %s2534_s15, %s2535_s16  }
  0x2e   :  { %2518 = dma.done.wait [#allocation4], 512  }
  0x2f   :  { %2519 = vsyncadd [#allocation4], 4294966784 }
  0x30   :  { %2520 = dma.done.wait [#allocation7], 768  }
  0x31   :  { %2521 = vsyncadd [#allocation7], 4294966528 }
  0x32   :  { %2522 = dma.done.wait [#allocation10], 6144  }
  0x33   :  { %2523 = vsyncadd [#allocation10], 4294961152  ;;  %v2536_v0 = vmov 0   ;;  %v2260_v1 = vld [vmem:[#allocation9 + $0x158] ss:$24 sps:$4 sm:$0xff]   ;;  %v82_v30 = vld [vmem:[#allocation3 + $0x10] sm:$0xff]  ;;  %v263_v35 = vlaneseq }
  0x34   :  { %385 = vmatprep.mubr.bf16.mxu1 %v2536_v0  ;;  %v2262_v2 = vld [vmem:[#allocation9 + $0x150] ss:$24 sps:$4 sm:$0xff]   ;;  %353 = vmatprep.subr.bf16.mxu1 %v2260_v1  ;;  %v2263_v3 = vld [vmem:[#allocation9 + $0x154] ss:$24 sps:$4 sm:$0xff]   ;;  %v2266_v5 = vld [vmem:[#allocation9 + $0x120] ss:$24 sps:$4 sm:$0xff]  }
  0x35   :  { %2091 = vmatprep.subr.bf16.mxu0 %v2262_v2  ;;  %v2264_v4 = vld [vmem:[#allocation9 + $0x128] ss:$24 sps:$4 sm:$0xff]   ;;  %354 = vmatpush1.bf16.msra.mxu1 %v2263_v3  ;;  %v2267_v6 = vld [vmem:[#allocation9 + $0x124] ss:$24 sps:$4 sm:$0xff]   ;;  %v2268_v7 = vld [vmem:[#allocation9 + $0xf8] ss:$24 sps:$4 sm:$0xff]  }
  0x36   :  { %2092 = vmatpush3.bf16.msra.mxu0 %v2262_v2  ;;  %355 = vmatprep.subr.bf16.mxu1 %v2264_v4  ;;  %v2270_v8 = vld [vmem:[#allocation9 + $0xf0] ss:$24 sps:$4 sm:$0xff]   ;;  %v2271_v9 = vld [vmem:[#allocation9 + $0xf4] ss:$24 sps:$4 sm:$0xff]   ;;  %v2274_v11 = vld [vmem:[#allocation9 + $0xc0] ss:$24 sps:$4 sm:$0xff]  }
  0x37   :  { %2093 = vmatprep.subr.bf16.mxu0 %v2266_v5  ;;  %v2272_v10 = vld [vmem:[#allocation9 + $0xc8] ss:$24 sps:$4 sm:$0xff]   ;;  %v2275_v12 = vld [vmem:[#allocation9 + $0xc4] ss:$24 sps:$4 sm:$0xff]   ;;  %v2276_v13 = vld [vmem:[#allocation9 + $0x98] ss:$24 sps:$4 sm:$0xff]  }
  0x38   :  { %v2278_v14 = vld [vmem:[#allocation9 + $0x90] ss:$24 sps:$4 sm:$0xff]   ;;  %v2279_v15 = vld [vmem:[#allocation9 + $0x94] ss:$24 sps:$4 sm:$0xff]   ;;  %v2282_v17 = vld [vmem:[#allocation9 + $0x60] ss:$24 sps:$4 sm:$0xff]  }
  0x39   :  { %356 = vmatpush1.bf16.msra.mxu1 %v2267_v6  ;;  %v2280_v16 = vld [vmem:[#allocation9 + $0x68] ss:$24 sps:$4 sm:$0xff]   ;;  %v80_v18 = vld [vmem:[#allocation3] sm:$0xff]  ;;  %v81_v19 = vld [vmem:[#allocation3 + $0x8] sm:$0xff]  ;;  %v2537_v34 = vmov 0.0   ;;  %vm2538_vm0 = vmmov 0  }
  0x3a   :  { %2094 = vmatpush3.bf16.msra.mxu0 %v2266_v5  ;;  %357 = vmatprep.subr.bf16.mxu1 %v2268_v7  ;;  %v2283_v20 = vld [vmem:[#allocation9 + $0x64] ss:$24 sps:$4 sm:$0xff]   ;;  %v2284_v21 = vld [vmem:[#allocation9 + $0x38] ss:$24 sps:$4 sm:$0xff]   ;;  %v87_v22 = vpack.c.bf16 %v81_v19, %v80_v18  ;;  %v2287_v24 = vld [vmem:[#allocation9 + $0x34] ss:$24 sps:$4 sm:$0xff]  }
  0x3b   :  { %2095 = vmatprep.subr.bf16.mxu0 %v2270_v8  ;;  %v2286_v23 = vld [vmem:[#allocation9 + $0x30] ss:$24 sps:$4 sm:$0xff]   ;;  %v2290_v26 = vld [vmem:[#allocation9] ss:$24 sps:$4 sm:$0xff]   ;;  %v2291_v27 = vld [vmem:[#allocation9 + $0x4] ss:$24 sps:$4 sm:$0xff]  }
  0x3c   :  { %2107 = vmatprep.mubr.bf16.mxu0 %v87_v22  ;;  %v2288_v25 = vld [vmem:[#allocation9 + $0x8] ss:$24 sps:$4 sm:$0xff]   ;;  %v84_v28 = vld [vmem:[#allocation6] sm:$0xff]  ;;  %v85_v29 = vld [vmem:[#allocation6 + $0x8] sm:$0xff]  ;;  %v2608_v36 = vshrl.u32 %v263_v35, 7  ;;  %vm398_vm1 = vcmask 261120  }
  0x3d   :  { %358 = vmatpush1.bf16.msra.mxu1 %v2271_v9  ;;  %v83_v31 = vld [vmem:[#allocation3 + $0x18] sm:$0xff]  ;;  %v86_v32 = vpack.c.bf16 %v85_v29, %v84_v28  ;;  %v154_v38 = vld [vmem:[%s2961_s4 + $0x1] sm:$0x3]  ;;  %v1939_v46 = vld [vmem:[%s2961_s4] ss:$0 sm:$0xff]  ;;  %vm473_vm2 = vcmask 1043456  }
  0x3e   :  { %2096 = vmatpush3.bf16.msra.mxu0 %v2270_v8  ;;  %359 = vmatprep.subr.bf16.mxu1 %v2272_v10  ;;  %v88_v33 = vpack.c.bf16 %v83_v31, %v82_v30  ;;  %v265_v37 = vsub.s32 0, %v2608_v36  ;;  %v269_v39 = vsub.s32 1, %v2608_v36  ;;  %s2539_s21 = smov 64   ;;  %s2540_s22 = smov 96   ;;  %vm446_vm3 = vcmask 64512  }
  0x3f   :  { %2097 = vmatprep.subr.bf16.mxu0 %v2274_v11  ;;  %s2541_s23 = smov 32   ;;  %vm526_vm4 = vcmask 257024   ;;  %vm667_vm5 = vcmask 519424   ;;  %vm805_vm6 = vcmask 781824   ;;  %vm943_vm7 = vcmask 1044224   ;;  %s2542_s10 = smov 0.0  }
  0x40   :  { %v266_v42 = vrot.slane %v154_v38, %v265_v37  ;;  %v270_v43 = vrot.slane %v154_v38, %v269_v39 }
  0x41   :  { %360 = vmatpush1.bf16.msra.mxu1 %v2275_v12 }
  0x42   :  { %2098 = vmatpush3.bf16.msra.mxu0 %v2274_v11  ;;  %361 = vmatprep.subr.bf16.mxu1 %v2276_v13 }
  0x43   :  { %2099 = vmatprep.subr.bf16.mxu0 %v2278_v14 }
  0x45   :  { %362 = vmatpush1.bf16.msra.mxu1 %v2279_v15 }
  0x46   :  { %2100 = vmatpush3.bf16.msra.mxu0 %v2278_v14  ;;  %363 = vmatprep.subr.bf16.mxu1 %v2280_v16 }
  0x47   :  { %2101 = vmatprep.subr.bf16.mxu0 %v2282_v17 }
  0x49   :  { %364 = vmatpush1.bf16.msra.mxu1 %v2283_v20 }
  0x4a   :  { %2102 = vmatpush3.bf16.msra.mxu0 %v2282_v17  ;;  %365 = vmatprep.subr.bf16.mxu1 %v2284_v21 }
  0x4b   :  { %2103 = vmatprep.subr.bf16.mxu0 %v2286_v23 }
  0x4d   :  { %366 = vmatpush1.bf16.msra.mxu1 %v2287_v24 }
  0x4e   :  { %2104 = vmatpush3.bf16.msra.mxu0 %v2286_v23  ;;  %367 = vmatprep.subr.bf16.mxu1 %v2288_v25 }
  0x4f   :  { %2105 = vmatprep.subr.bf16.mxu0 %v2290_v26 }
  0x51   :  { %368 = vmatpush1.bf16.msra.mxu1 %v2291_v27 }
  0x52   :  { %2106 = vmatpush3.bf16.msra.mxu0 %v2290_v26  ;;  %2117 = vmatprep.subr.bf16.mxu1 %v2537_v34 }
  0x53   :  { %2111 = vmatprep.subr.bf16.mxu0 %v2537_v34 }
  0x54   :  { %386 = vmatmul.mubr.bf16.vlgmr.msra.gmra.mxu1 %v86_v32 }
  0x55   :  { %2108 = vmatmul.mubr.bf16.vlgmr.msra.gmra.mxu0 %v88_v33  ;;  %2119 = vmatprep.mubr.msk.bf16.mxu1 %vm2538_vm0, %v2537_v34 }
  0x56   :  { %2113 = vmatprep.mubr.msk.bf16.mxu0 %vm2538_vm0, %v2537_v34 }
 0x114   :  { %v387_v40 = vpop.f32.mrf.mxu1 }
 0x115   :  { %v2109_v41 = vpop.f32.mrf.mxu0  ;;  %v388_v49 = vadd.f32 %v387_v40, %v266_v42 }
 0x116   :  { %v389_v44 = vpop.f32.mrf.mxu1  ;;  %v254_v62 = vadd.f32 %v2109_v41, %v1939_v46 }
 0x117   :  { %v245_v45 = vpop.f32.mrf.mxu0  ;;  %v390_v51 = vadd.f32 %v389_v44, %v270_v43 }
 0x118   :  { %v391_v47 = vpop.f32.mrf.mxu1  ;;  %v246_v54 = vadd.f32 %v1939_v46, %v245_v45 }
 0x119   :  { %v2110_v48 = vpop.f32.mrf.mxu0  ;;  %v392_v50 = vadd.f32 %v391_v47, %v266_v42 }
 0x11a   :  { %v393_v52 = vpop.f32.mrf.mxu1  ;;  %v257_v63 = vadd.f32 %v2110_v48, %v1939_v46 }
 0x11b   :  { %v248_v53 = vpop.f32.mrf.mxu0  ;;  %v396_v55 = vpack.c.bf16 %v392_v50, %v388_v49  ;;  %v394_v56 = vadd.f32 %v393_v52, %v270_v43 }
 0x11c   :  { %v249_v57 = vadd.f32 %v1939_v46, %v248_v53  ;;  %v261_v1 = vpack.c.bf16 %v257_v63, %v254_v62 }
 0x11d   :  { %v2622_v58 = vpack.c.bf16 %v394_v56, %v390_v51  ;;  %672 = vrot.lane.b32.xlu1 %v396_v55, %s2539_s21  ;;  %533 = vrot.lane.b32.xlu0 %v396_v55, %s2540_s22  ;;  %v403_v59 = vsel %vm398_vm1, %v396_v55, 0  ;;  %v946_v2 = vrot.slane %v396_v55, 4 }
 0x11e   :  { %2112 = vmatpush3.bf16.xpose.msra.mxu0 %v403_v59  ;;  %v260_v60 = vpack.c.bf16 %v249_v57, %v246_v54 }
 0x11f   :  { %v475_v61 = vsel %vm473_vm2, %v2622_v58, 0  ;;  %2123 = vmatprep.subr.bf16.mxu0 %v2537_v34  ;;  %v951_v12 = vsel %vm398_vm1, %v946_v2, 0 }
 0x120   :  { %2118 = vmatpush3.bf16.msra.mxu1 %v475_v61 }
 0x121   :  { %670 = vrot.lane.b32.xlu1 %v260_v60, %s2539_s21  ;;  %530 = vrot.lane.b32.xlu0 %v260_v60, %s2540_s22 }
 0x122   :  { %2129 = vmatprep.subr.bf16.mxu1 %v2537_v34 }
 0x125   :  { %808 = vrot.lane.b32.xlu1 %v260_v60, %s2541_s23  ;;  %810 = vrot.lane.b32.xlu0 %v396_v55, %s2541_s23 }
 0x126   :  { %2114 = vmatmul.mubr.msk.bf16.vlgmr.msra.gmra.mxu0 %vm398_vm1, %v260_v60 }
 0x127   :  { %2125 = vmatprep.mubr.msk.bf16.mxu0 %vm2538_vm0, %v2537_v34 }
 0x129   :  { %1076 = vrot.lane.b32.xlu1 %v261_v1, %s2540_s22  ;;  %1078 = vrot.lane.b32.xlu0 %v946_v2, %s2540_s22 }
 0x12d   :  { %1213 = vrot.lane.b32.xlu1 %v261_v1, %s2539_s21  ;;  %1215 = vrot.lane.b32.xlu0 %v946_v2, %s2539_s21 }
 0x131   :  { %1350 = vrot.lane.b32.xlu1 %v261_v1, %s2541_s23  ;;  %1352 = vrot.lane.b32.xlu0 %v946_v2, %s2541_s23 }
 0x18f   :  { %v534_v3 = vpop.permute.xlu0 %533  ;;  %v673_v5 = vpop.permute.xlu1 %672 }
 0x190   :  { %v539_v4 = vsel %vm398_vm1, %v534_v3, 0  ;;  %v678_v7 = vsel %vm398_vm1, %v673_v5, 0 }
 0x191   :  { %2124 = vmatpush3.bf16.xpose.msra.mxu0 %v539_v4 }
 0x192   :  { %2135 = vmatprep.subr.bf16.mxu0 %v2537_v34 }
 0x193   :  { %v531_v6 = vpop.permute.xlu0 %530  ;;  %v671_v9 = vpop.permute.xlu1 %670 }
 0x197   :  { %v811_v8 = vpop.permute.xlu0 %810  ;;  %v809_v11 = vpop.permute.xlu1 %808 }
 0x198   :  { %2126 = vmatmul.mubr.msk.bf16.vlgmr.msra.gmra.mxu0 %vm398_vm1, %v531_v6  ;;  %v816_v10 = vsel %vm398_vm1, %v811_v8, 0 }
 0x199   :  { %2136 = vmatpush3.bf16.xpose.msra.mxu0 %v678_v7  ;;  %2137 = vmatprep.mubr.msk.bf16.mxu0 %vm2538_vm0, %v2537_v34 }
 0x19a   :  { %2147 = vmatprep.subr.bf16.mxu0 %v2537_v34 }
 0x19b   :  { %v1079_v13 = vpop.permute.xlu0 %1078  ;;  %v1077_v16 = vpop.permute.xlu1 %1076 }
 0x19c   :  { %v1084_v14 = vsel %vm398_vm1, %v1079_v13, 0 }
 0x19f   :  { %v1216_v15 = vpop.permute.xlu0 %1215  ;;  %v1214_v19 = vpop.permute.xlu1 %1213 }
 0x1a0   :  { %2138 = vmatmul.mubr.msk.bf16.vlgmr.msra.gmra.mxu0 %vm398_vm1, %v671_v9  ;;  %v1221_v17 = vsel %vm398_vm1, %v1216_v15, 0 }
 0x1a1   :  { %2148 = vmatpush3.bf16.xpose.msra.mxu0 %v816_v10  ;;  %2149 = vmatprep.mubr.msk.bf16.mxu0 %vm2538_vm0, %v2537_v34 }
 0x1a2   :  { %2159 = vmatprep.subr.bf16.mxu0 %v2537_v34 }
 0x1a3   :  { %v1353_v18 = vpop.permute.xlu0 %1352  ;;  %v1351_v21 = vpop.permute.xlu1 %1350 }
 0x1a4   :  { %v1358_v20 = vsel %vm398_vm1, %v1353_v18, 0 }
 0x1a8   :  { %2150 = vmatmul.mubr.msk.bf16.vlgmr.msra.gmra.mxu0 %vm398_vm1, %v809_v11 }
 0x1a9   :  { %2160 = vmatpush3.bf16.xpose.msra.mxu0 %v951_v12  ;;  %2161 = vmatprep.mubr.msk.bf16.mxu0 %vm2538_vm0, %v2537_v34 }
 0x1aa   :  { %2171 = vmatprep.subr.bf16.mxu0 %v2537_v34 }
 0x1b0   :  { %2162 = vmatmul.mubr.msk.bf16.vlgmr.msra.gmra.mxu0 %vm398_vm1, %v261_v1 }
 0x1b1   :  { %2172 = vmatpush3.bf16.xpose.msra.mxu0 %v1084_v14  ;;  %2173 = vmatprep.mubr.msk.bf16.mxu0 %vm2538_vm0, %v2537_v34 }
 0x1b2   :  { %2183 = vmatprep.subr.bf16.mxu0 %v2537_v34 }
 0x1b8   :  { %2174 = vmatmul.mubr.msk.bf16.vlgmr.msra.gmra.mxu0 %vm398_vm1, %v1077_v16 }
 0x1b9   :  { %2184 = vmatpush3.bf16.xpose.msra.mxu0 %v1221_v17  ;;  %2185 = vmatprep.mubr.msk.bf16.mxu0 %vm2538_vm0, %v2537_v34 }
 0x1ba   :  { %2195 = vmatprep.subr.bf16.mxu0 %v2537_v34 }
 0x1c0   :  { %2186 = vmatmul.mubr.msk.bf16.vlgmr.msra.gmra.mxu0 %vm398_vm1, %v1214_v19 }
 0x1c1   :  { %2196 = vmatpush3.bf16.xpose.msra.mxu0 %v1358_v20  ;;  %2197 = vmatprep.mubr.msk.bf16.mxu0 %vm2538_vm0, %v2537_v34 }
 0x1c8   :  { %2198 = vmatmul.mubr.msk.bf16.vlgmr.msra.gmra.mxu0 %vm398_vm1, %v1351_v21 }
 0x1c9   :  { %1626 = vmatprep.mubr.bf16.mxu0 %v2536_v0 }
 0x1e6   :  { %v2677_v22 = vpop.f32.mrf.mxu0 }
 0x1e7   :  { %v447_v23 = vsel %vm446_vm3, %v2677_v22, -inf }
 0x1e8   :  { %448 = vmax.xlane.f32.xlu0 %v447_v23  ;;  %v2115_v24 = vpop.f32.mrf.mxu0 }
 0x1ea   :  { %v442_v25 = vpop.f32.mrf.mxu0 }
 0x1eb   :  { %v450_v26 = vsel %vm446_vm3, %v442_v25, -inf }
 0x1ec   :  { %451 = vmax.xlane.f32.xlu1 %v450_v26  ;;  %v2116_v27 = vpop.f32.mrf.mxu0 }
 0x258   :  { %v2682_v28 = vpop.f32.mrf.mxu0 }
 0x259   :  { %v582_v29 = vsel %vm446_vm3, %v2682_v28, -inf }
 0x25a   :  { %583 = vmax.xlane.f32.xlu0 %v582_v29  ;;  %v2127_v30 = vpop.f32.mrf.mxu0 }
 0x25c   :  { %v2686_v31 = vpop.f32.mrf.mxu0 }
 0x25d   :  { %v585_v32 = vsel %vm446_vm3, %v2686_v31, -inf }
 0x25e   :  { %586 = vmax.xlane.f32.xlu0 %v585_v32  ;;  %v2128_v33 = vpop.f32.mrf.mxu0 }
 0x260   :  { %v2690_v35 = vpop.f32.mrf.mxu0 }
 0x261   :  { %v721_v38 = vsel %vm446_vm3, %v2690_v35, -inf }
 0x262   :  { %722 = vmax.xlane.f32.xlu1 %v721_v38  ;;  %v2139_v40 = vpop.f32.mrf.mxu0 }
 0x264   :  { %v2694_v41 = vpop.f32.mrf.mxu0 }
 0x265   :  { %v724_v42 = vsel %vm446_vm3, %v2694_v41, -inf }
 0x266   :  { %725 = vmax.xlane.f32.xlu0 %v724_v42  ;;  %v2140_v43 = vpop.f32.mrf.mxu0 }
 0x268   :  { %v2698_v44 = vpop.f32.mrf.mxu0 }
 0x269   :  { %v859_v45 = vsel %vm446_vm3, %v2698_v44, -inf }
 0x26a   :  { %860 = vmax.xlane.f32.xlu1 %v859_v45  ;;  %v2151_v46 = vpop.f32.mrf.mxu0 }
 0x26c   :  { %v2702_v47 = vpop.f32.mrf.mxu0 }
 0x26d   :  { %v862_v48 = vsel %vm446_vm3, %v2702_v47, -inf }
 0x26e   :  { %863 = vmax.xlane.f32.xlu0 %v862_v48  ;;  %v2152_v49 = vpop.f32.mrf.mxu0 }
 0x270   :  { %v2706_v50 = vpop.f32.mrf.mxu0 }
 0x271   :  { %v449_v13 = vpop.xlane.xlu0 %448  ;;  %v994_v16 = vsel %vm446_vm3, %v2706_v50, -inf }
 0x272   :  { %v2163_v51 = vpop.f32.mrf.mxu0  ;;  %v453_v14 = vsub.f32 %v2677_v22, %v449_v13 }
 0x274   :  { %v2708_v52 = vpop.f32.mrf.mxu0  ;;  %v455_v15 = vmul.f32 1.442695, %v453_v14 }
 0x275   :  { %v452_v53 = vpop.xlane.xlu1 %451  ;;  %v997_v54 = vsel %vm446_vm3, %v2708_v52, -inf }
 0x276   :  { %v454_v55 = vsub.f32 %v442_v25, %v452_v53  ;;  %998 = vmax.xlane.f32.xlu0 %v997_v54  ;;  %v2164_v56 = vpop.f32.mrf.mxu0 }
 0x278   :  { %v457_v57 = vmul.f32 1.442695, %v454_v55  ;;  %v2712_v59 = vpop.f32.mrf.mxu0 }
 0x279   :  { %v1127_v17 = vsel %vm446_vm3, %v2712_v59, -inf }
 0x27a   :  { %2326 = vpow2.f32 %v457_v57  ;;  %v2175_v60 = vpop.f32.mrf.mxu0 }
 0x27b   :  { %606 = vrot.lane.b32.xlu1 %v2622_v58, %s2540_s22  ;;  %2328 = vpow2.f32 %v455_v15 }
 0x27c   :  { %v2716_v61 = vpop.f32.mrf.mxu0 }
 0x27d   :  { %v1130_v62 = vsel %vm446_vm3, %v2716_v61, -inf }
 0x27e   :  { %1131 = vmax.xlane.f32.xlu0 %v1130_v62  ;;  %v2176_v63 = vpop.f32.mrf.mxu0 }
 0x280   :  { %v2720_v1 = vpop.f32.mrf.mxu0 }
 0x281   :  { %v1264_v18 = vsel %vm446_vm3, %v2720_v1, -inf }
 0x282   :  { %v2187_v2 = vpop.f32.mrf.mxu0 }
 0x284   :  { %v2722_v3 = vpop.f32.mrf.mxu0 }
 0x285   :  { %v1267_v4 = vsel %vm446_vm3, %v2722_v3, -inf }
 0x286   :  { %1268 = vmax.xlane.f32.xlu0 %v1267_v4  ;;  %v2188_v5 = vpop.f32.mrf.mxu0 }
 0x287   :  { %v2726_v6 = vpop.eup %2326 }
 0x288   :  { %v2728_v7 = vpop.f32.mrf.mxu0  ;;  %v462_v8 = vsel %vm446_vm3, %v2726_v6, 0.0  ;;  %v2743_v19 = vpop.eup %2328 }
 0x289   :  { %v459_v20 = vsel %vm446_vm3, %v2743_v19, 0.0  ;;  %v1401_v21 = vsel %vm446_vm3, %v2728_v7, -inf }
 0x28a   :  { %463 = vadd.xlane.f32.xlu0 %v462_v8  ;;  %v2199_v9 = vpop.f32.mrf.mxu0 }
 0x28c   :  { %v2732_v10 = vpop.f32.mrf.mxu0 }
 0x28d   :  { %v1404_v11 = vsel %vm446_vm3, %v2732_v10, -inf }
 0x28e   :  { %1405 = vmax.xlane.f32.xlu0 %v1404_v11  ;;  %v2200_v12 = vpop.f32.mrf.mxu0 }
 0x29f   :  { %995 = vmax.xlane.f32.xlu1 %v994_v16 }
 0x2a3   :  { %1128 = vmax.xlane.f32.xlu1 %v1127_v17 }
 0x2a7   :  { %1265 = vmax.xlane.f32.xlu1 %v1264_v18 }
 0x2ab   :  { %460 = vadd.xlane.f32.xlu1 %v459_v20 }
 0x2af   :  { %1402 = vmax.xlane.f32.xlu1 %v1401_v21 }
 0x2e3   :  { %v584_v22 = vpop.xlane.xlu0 %583 }
 0x2e4   :  { %v588_v23 = vsub.f32 %v2682_v28, %v584_v22 }
 0x2e6   :  { %v590_v24 = vmul.f32 1.442695, %v588_v23 }
 0x2e7   :  { %v587_v25 = vpop.xlane.xlu0 %586 }
 0x2e8   :  { %2330 = vpow2.f32 %v590_v24  ;;  %v589_v26 = vsub.f32 %v2686_v31, %v587_v25 }
 0x2ea   :  { %v592_v27 = vmul.f32 1.442695, %v589_v26 }
 0x2eb   :  { %v723_v29 = vpop.xlane.xlu1 %722 }
 0x2ec   :  { %2332 = vpow2.f32 %v592_v27  ;;  %v727_v30 = vsub.f32 %v2690_v35, %v723_v29 }
 0x2ee   :  { %v729_v32 = vmul.f32 1.442695, %v727_v30 }
 0x2ef   :  { %v726_v33 = vpop.xlane.xlu0 %725 }
 0x2f0   :  { %2334 = vpow2.f32 %v729_v32  ;;  %v728_v38 = vsub.f32 %v2694_v41, %v726_v33 }
 0x2f2   :  { %v731_v40 = vmul.f32 1.442695, %v728_v38 }
 0x2f3   :  { %v861_v42 = vpop.xlane.xlu1 %860 }
 0x2f4   :  { %2336 = vpow2.f32 %v731_v40  ;;  %v865_v28 = vsub.f32 %v2698_v44, %v861_v42 }
 0x2f5   :  { %v2754_v43 = vpop.eup %2330 }
 0x2f6   :  { %v867_v45 = vmul.f32 1.442695, %v865_v28  ;;  %v594_v31 = vsel %vm446_vm3, %v2754_v43, 0.0 }
 0x2f7   :  { %v864_v46 = vpop.xlane.xlu0 %863  ;;  %595 = vadd.xlane.f32.xlu1 %v594_v31  ;;  %v607_v63 = vpop.permute.xlu1 %606 }
 0x2f8   :  { %2338 = vpow2.f32 %v867_v45  ;;  %v866_v35 = vsub.f32 %v2702_v47, %v864_v46  ;;  %v612_v46 = vsel %vm473_vm2, %v607_v63, 0 }
 0x2f9   :  { %v2759_v48 = vpop.eup %2332 }
 0x2fa   :  { %v869_v49 = vmul.f32 1.442695, %v866_v35  ;;  %v597_v41 = vsel %vm446_vm3, %v2759_v48, 0.0 }
 0x2fb   :  { %598 = vadd.xlane.f32.xlu0 %v597_v41 }
 0x2fc   :  { %2340 = vpow2.f32 %v869_v49 }
 0x2fd   :  { %v2763_v44 = vpop.eup %2334 }
 0x2fe   :  { %v733_v51 = vsel %vm446_vm3, %v2763_v44, 0.0 }
 0x2ff   :  { %734 = vadd.xlane.f32.xlu1 %v733_v51  ;;  %v999_v60 = vpop.xlane.xlu0 %998 }
 0x300   :  { %v1001_v2 = vsub.f32 %v2708_v52, %v999_v60 }
 0x301   :  { %v2767_v53 = vpop.eup %2336 }
 0x302   :  { %v736_v54 = vsel %vm446_vm3, %v2767_v53, 0.0  ;;  %v1004_v11 = vmul.f32 1.442695, %v1001_v2 }
 0x303   :  { %737 = vadd.xlane.f32.xlu0 %v736_v54 }
 0x305   :  { %v2771_v47 = vpop.eup %2338 }
 0x306   :  { %v871_v55 = vsel %vm446_vm3, %v2771_v47, 0.0 }
 0x307   :  { %872 = vadd.xlane.f32.xlu1 %v871_v55  ;;  %v1132_v62 = vpop.xlane.xlu0 %1131 }
 0x308   :  { %v1134_v4 = vsub.f32 %v2716_v61, %v1132_v62 }
 0x309   :  { %v2775_v56 = vpop.eup %2340 }
 0x30a   :  { %v874_v57 = vsel %vm446_vm3, %v2775_v56, 0.0  ;;  %v1137_v13 = vmul.f32 1.442695, %v1134_v4 }
 0x30b   :  { %875 = vadd.xlane.f32.xlu0 %v874_v57 }
 0x30f   :  { %v1269_v5 = vpop.xlane.xlu0 %1268 }
 0x310   :  { %v1271_v12 = vsub.f32 %v2722_v3, %v1269_v5 }
 0x312   :  { %v1274_v17 = vmul.f32 1.442695, %v1271_v12 }
 0x313   :  { %v464_v20 = vpop.xlane.xlu0 %463 }
 0x317   :  { %v1406_v49 = vpop.xlane.xlu0 %1405 }
 0x318   :  { %882 = vrot.lane.b32.xlu1 %v2622_v58, %s2541_s23  ;;  %v1408_v41 = vsub.f32 %v2732_v10, %v1406_v49 }
 0x31a   :  { %v1411_v51 = vmul.f32 1.442695, %v1408_v41 }
 0x321   :  { %744 = vrot.lane.b32.xlu0 %v2622_v58, %s2539_s21 }
 0x328   :  { %v996_v8 = vpop.xlane.xlu1 %995 }
 0x329   :  { %v1000_v9 = vsub.f32 %v2706_v50, %v996_v8 }
 0x32b   :  { %v1002_v14 = vmul.f32 1.442695, %v1000_v9 }
 0x32c   :  { %v1129_v15 = vpop.xlane.xlu1 %1128 }
 0x32d   :  { %2342 = vpow2.f32 %v1002_v14  ;;  %v1133_v16 = vsub.f32 %v2712_v59, %v1129_v15 }
 0x32e   :  { %2344 = vpow2.f32 %v1004_v11 }
 0x32f   :  { %2346 = vpow2.f32 %v1137_v13  ;;  %v1135_v18 = vmul.f32 1.442695, %v1133_v16 }
 0x330   :  { %v1266_v52 = vpop.xlane.xlu1 %1265  ;;  %2348 = vpow2.f32 %v1274_v17 }
 0x331   :  { %v1270_v61 = vsub.f32 %v2720_v1, %v1266_v52  ;;  %2350 = vpow2.f32 %v1135_v18 }
 0x332   :  { %2352 = vrcp.f32 %v464_v20 }
 0x333   :  { %v1272_v50 = vmul.f32 1.442695, %v1270_v61 }
 0x334   :  { %v461_v21 = vpop.xlane.xlu1 %460 }
 0x335   :  { %2354 = vrcp.f32 %v461_v21 }
 0x336   :  { %2356 = vpow2.f32 %v1272_v50 }
 0x338   :  { %v1403_v3 = vpop.xlane.xlu1 %1402 }
 0x339   :  { %v1407_v22 = vsub.f32 %v2728_v7, %v1403_v3 }
 0x33a   :  { %v2790_v23 = vpop.eup %2342 }
 0x33b   :  { %v2792_v59 = vpop.eup %2344  ;;  %v1409_v24 = vmul.f32 1.442695, %v1407_v22  ;;  %v1006_v25 = vsel %vm446_vm3, %v2790_v23, 0.0 }
 0x33c   :  { %v2796_v26 = vpop.eup %2346  ;;  %1007 = vadd.xlane.f32.xlu1 %v1006_v25  ;;  %v1009_v7 = vsel %vm446_vm3, %v2792_v59, 0.0 }
 0x33d   :  { %2358 = vpow2.f32 %v1409_v24  ;;  %v2798_v1 = vpop.eup %2348  ;;  %v1142_v27 = vsel %vm446_vm3, %v2796_v26, 0.0 }
 0x33e   :  { %v2804_v29 = vpop.eup %2350  ;;  %v1279_v33 = vsel %vm446_vm3, %v2798_v1, 0.0  ;;  %2360 = vpow2.f32 %v1411_v51 }
 0x33f   :  { %v2353_v30 = vpop.eup %2352  ;;  %v1139_v38 = vsel %vm446_vm3, %v2804_v29, 0.0 }
 0x340   :  { %1143 = vadd.xlane.f32.xlu1 %v1142_v27  ;;  %1010 = vadd.xlane.f32.xlu0 %v1009_v7  ;;  %v468_v28 = vmul.f32 %v2353_v30, %v2726_v6 }
 0x342   :  { %v2355_v32 = vpop.eup %2354 }
 0x343   :  { %v2810_v40 = vpop.eup %2356  ;;  %v467_v42 = vmul.f32 %v2355_v32, %v2743_v19  ;;  %v1017_v19 = vrot.slane %v2622_v58, 4 }
 0x344   :  { %1280 = vadd.xlane.f32.xlu1 %v1279_v33  ;;  %1140 = vadd.xlane.f32.xlu0 %v1139_v38  ;;  %v1276_v31 = vsel %vm446_vm3, %v2810_v40, 0.0 }
 0x345   :  { %v469_v45 = vpack.c.bf16 %v468_v28, %v467_v42 }
 0x347   :  { %2120 = vmatmul.mubr.msk.bf16.vlgmr.msra.gmra.mxu1 %vm446_vm3, %v469_v45 }
 0x348   :  { %1277 = vadd.xlane.f32.xlu0 %v1276_v31  ;;  %2130 = vmatpush3.bf16.msra.mxu1 %v612_v46 }
 0x349   :  { %2131 = vmatprep.mubr.msk.bf16.mxu1 %vm2538_vm0, %v2537_v34  ;;  %2141 = vmatprep.subr.bf16.mxu1 %v2537_v34 }
 0x34a   :  { %v2820_v35 = vpop.eup %2358 }
 0x34b   :  { %v1413_v6 = vsel %vm446_vm3, %v2820_v35, 0.0  ;;  %v2829_v54 = vpop.eup %2360 }
 0x34c   :  { %1414 = vadd.xlane.f32.xlu0 %v1413_v6  ;;  %v1416_v55 = vsel %vm446_vm3, %v2829_v54, 0.0 }
 0x355   :  { %1287 = vrot.lane.b32.xlu1 %v1017_v19, %s2539_s21 }
 0x362   :  { %1150 = vrot.lane.b32.xlu0 %v1017_v19, %s2540_s22 }
 0x379   :  { %1417 = vadd.xlane.f32.xlu1 %v1416_v55 }
 0x380   :  { %v596_v57 = vpop.xlane.xlu1 %595 }
 0x381   :  { %2362 = vrcp.f32 %v596_v57 }
 0x384   :  { %v599_v60 = vpop.xlane.xlu0 %598 }
 0x385   :  { %2364 = vrcp.f32 %v599_v60 }
 0x388   :  { %v735_v58 = vpop.xlane.xlu1 %734 }
 0x389   :  { %2366 = vrcp.f32 %v735_v58 }
 0x38a   :  { %1424 = vrot.lane.b32.xlu1 %v1017_v19, %s2541_s23 }
 0x38c   :  { %v738_v62 = vpop.xlane.xlu0 %737 }
 0x38d   :  { %2368 = vrcp.f32 %v738_v62 }
 0x38e   :  { %v2363_v10 = vpop.eup %2362 }
 0x38f   :  { %v602_v4 = vmul.f32 %v2363_v10, %v2754_v43 }
 0x390   :  { %v873_v63 = vpop.xlane.xlu1 %872 }
 0x391   :  { %2370 = vrcp.f32 %v873_v63 }
 0x392   :  { %v2365_v2 = vpop.eup %2364 }
 0x393   :  { %v603_v5 = vmul.f32 %v2365_v2, %v2759_v48 }
 0x394   :  { %v876_v8 = vpop.xlane.xlu0 %875  ;;  %v883_v15 = vpop.permute.xlu1 %882 }
 0x395   :  { %2372 = vrcp.f32 %v876_v8  ;;  %v604_v9 = vpack.c.bf16 %v603_v5, %v602_v4  ;;  %v888_v17 = vsel %vm473_vm2, %v883_v15, 0  ;;  %v2292_v5 = vld [vmem:[#allocation9 + $0x15c] ss:$24 sps:$4 sm:$0xff]   ;;  %v2294_v8 = vld [vmem:[#allocation9 + $0x160] ss:$24 sps:$4 sm:$0xff]  }
 0x396   :  { %v2367_v11 = vpop.eup %2366  ;;  %1594 = vmatprep.subr.bf16.mxu0 %v2294_v8  ;;  %v2306_v15 = vld [vmem:[#allocation9 + $0xa0] ss:$24 sps:$4 sm:$0xff]  }
 0x397   :  { %2132 = vmatmul.mubr.msk.bf16.vlgmr.msra.gmra.mxu1 %vm446_vm3, %v604_v9  ;;  %v741_v43 = vmul.f32 %v2367_v11, %v2763_v44  ;;  %1595 = vmatpush1.bf16.msra.mxu0 %v2292_v5  ;;  %v2295_v9 = vld [vmem:[#allocation9 + $0x12c] ss:$24 sps:$4 sm:$0xff]   ;;  %v2297_v11 = vld [vmem:[#allocation9 + $0x130] ss:$24 sps:$4 sm:$0xff]  }
 0x398   :  { %v745_v12 = vpop.permute.xlu0 %744  ;;  %2143 = vmatprep.mubr.msk.bf16.mxu1 %vm2538_vm0, %v2537_v34  ;;  %1596 = vmatprep.subr.bf16.mxu0 %v2297_v11 }
 0x399   :  { %v750_v13 = vsel %vm473_vm2, %v745_v12, 0  ;;  %v2298_v12 = vld [vmem:[#allocation9 + $0xfc] ss:$24 sps:$4 sm:$0xff]  }
 0x39a   :  { %v2369_v14 = vpop.eup %2368  ;;  %2142 = vmatpush3.bf16.msra.mxu1 %v750_v13  ;;  %v2300_v13 = vld [vmem:[#allocation9 + $0x100] ss:$24 sps:$4 sm:$0xff]  }
 0x39b   :  { %2153 = vmatprep.subr.bf16.mxu1 %v2537_v34  ;;  %v742_v48 = vmul.f32 %v2369_v14, %v2767_v53  ;;  %v1022_v53 = vsel %vm473_vm2, %v1017_v19, 0  ;;  %1597 = vmatpush1.bf16.msra.mxu0 %v2295_v9  ;;  %v2303_v14 = vld [vmem:[#allocation9 + $0xd0] ss:$24 sps:$4 sm:$0xff]  }
 0x39c   :  { %1598 = vmatprep.subr.bf16.mxu0 %v2300_v13 }
 0x39d   :  { %v743_v16 = vpack.c.bf16 %v742_v48, %v741_v43 }
 0x39e   :  { %v2371_v18 = vpop.eup %2370 }
 0x39f   :  { %2144 = vmatmul.mubr.msk.bf16.vlgmr.msra.gmra.mxu1 %vm446_vm3, %v743_v16  ;;  %v879_v20 = vmul.f32 %v2371_v18, %v2771_v47  ;;  %1599 = vmatpush1.bf16.msra.mxu0 %v2298_v12 }
 0x3a0   :  { %2154 = vmatpush3.bf16.msra.mxu1 %v888_v17  ;;  %2155 = vmatprep.mubr.msk.bf16.mxu1 %vm2538_vm0, %v2537_v34  ;;  %v2304_v17 = vld [vmem:[#allocation9 + $0x9c] ss:$24 sps:$4 sm:$0xff]  }
 0x3a1   :  { %2165 = vmatprep.subr.bf16.mxu1 %v2537_v34  ;;  %1600 = vmatprep.subr.bf16.mxu0 %v2303_v14 }
 0x3a2   :  { %v2373_v52 = vpop.eup %2372 }
 0x3a3   :  { %v880_v44 = vmul.f32 %v2373_v52, %v2775_v56 }
 0x3a5   :  { %v881_v61 = vpack.c.bf16 %v880_v44, %v879_v20  ;;  %v2307_v20 = vld [vmem:[#allocation9 + $0x6c] ss:$24 sps:$4 sm:$0xff]   ;;  %v2309_v44 = vld [vmem:[#allocation9 + $0x70] ss:$24 sps:$4 sm:$0xff]  }
 0x3a7   :  { %2156 = vmatmul.mubr.msk.bf16.vlgmr.msra.gmra.mxu1 %vm446_vm3, %v881_v61 }
 0x3a8   :  { %2166 = vmatpush3.bf16.msra.mxu1 %v1022_v53  ;;  %2167 = vmatprep.mubr.msk.bf16.mxu1 %vm2538_vm0, %v2537_v34 }
 0x3a9   :  { %2177 = vmatprep.subr.bf16.mxu1 %v2537_v34 }
 0x3c5   :  { %v1008_v50 = vpop.xlane.xlu1 %1007 }
 0x3c6   :  { %2374 = vrcp.f32 %v1008_v50 }
 0x3c9   :  { %v1011_v21 = vpop.xlane.xlu0 %1010  ;;  %v1144_v22 = vpop.xlane.xlu1 %1143 }
 0x3ca   :  { %2376 = vrcp.f32 %v1011_v21  ;;  %v2310_v21 = vld [vmem:[#allocation9 + $0x3c] ss:$24 sps:$4 sm:$0xff]  }
 0x3cd   :  { %v1141_v3 = vpop.xlane.xlu0 %1140  ;;  %v1281_v25 = vpop.xlane.xlu1 %1280 }
 0x3ce   :  { %2378 = vrcp.f32 %v1141_v3  ;;  %v2312_v3 = vld [vmem:[#allocation9 + $0x40] ss:$24 sps:$4 sm:$0xff]  }
 0x3cf   :  { %2380 = vrcp.f32 %v1144_v22  ;;  %v2315_v22 = vld [vmem:[#allocation9 + $0x10] ss:$24 sps:$4 sm:$0xff]  }
 0x3d1   :  { %v1278_v47 = vpop.xlane.xlu0 %1277 }
 0x3d2   :  { %2382 = vrcp.f32 %v1278_v47 }
 0x3d3   :  { %v2375_v24 = vpop.eup %2374  ;;  %2384 = vrcp.f32 %v1281_v25  ;;  %v2313_v25 = vld [vmem:[#allocation9 + $0xc] ss:$24 sps:$4 sm:$0xff]  }
 0x3d4   :  { %v1014_v30 = vmul.f32 %v2375_v24, %v2790_v23  ;;  %v1288_v23 = vpop.permute.xlu1 %1287 }
 0x3d5   :  { %v1415_v56 = vpop.xlane.xlu0 %1414  ;;  %v1293_v6 = vsel %vm473_vm2, %v1288_v23, 0 }
 0x3d6   :  { %2386 = vrcp.f32 %v1415_v56 }
 0x3d7   :  { %v2377_v27 = vpop.eup %2376 }
 0x3d8   :  { %v1015_v32 = vmul.f32 %v2377_v27, %v2792_v59 }
 0x3d9   :  { %v1151_v7 = vpop.permute.xlu0 %1150 }
 0x3da   :  { %v1156_v33 = vsel %vm473_vm2, %v1151_v7, 0  ;;  %v1016_v38 = vpack.c.bf16 %v1015_v32, %v1014_v30 }
 0x3db   :  { %v2379_v42 = vpop.eup %2378 }
 0x3dc   :  { %2168 = vmatmul.mubr.msk.bf16.vlgmr.msra.gmra.mxu1 %vm446_vm3, %v1016_v38  ;;  %v2381_v28 = vpop.eup %2380  ;;  %v1147_v45 = vmul.f32 %v2379_v42, %v2804_v29 }
 0x3dd   :  { %2178 = vmatpush3.bf16.msra.mxu1 %v1156_v33  ;;  %2179 = vmatprep.mubr.msk.bf16.mxu1 %vm2538_vm0, %v2537_v34  ;;  %v1148_v31 = vmul.f32 %v2381_v28, %v2796_v26 }
 0x3de   :  { %2189 = vmatprep.subr.bf16.mxu1 %v2537_v34 }
 0x3df   :  { %v1149_v46 = vpack.c.bf16 %v1148_v31, %v1147_v45  ;;  %v2383_v59 = vpop.eup %2382 }
 0x3e0   :  { %v2385_v19 = vpop.eup %2384  ;;  %v1284_v49 = vmul.f32 %v2383_v59, %v2810_v40 }
 0x3e1   :  { %v1285_v29 = vmul.f32 %v2385_v19, %v2798_v1 }
 0x3e3   :  { %v1286_v41 = vpack.c.bf16 %v1285_v29, %v1284_v49  ;;  %v2387_v62 = vpop.eup %2386 }
 0x3e4   :  { %2180 = vmatmul.mubr.msk.bf16.vlgmr.msra.gmra.mxu1 %vm446_vm3, %v1149_v46  ;;  %v1421_v63 = vmul.f32 %v2387_v62, %v2820_v35  ;;  %v2301_v35 = vld [vmem:[#allocation9 + $0xcc] ss:$24 sps:$4 sm:$0xff]  }
 0x3e5   :  { %2190 = vmatpush3.bf16.msra.mxu1 %v1293_v6  ;;  %2191 = vmatprep.mubr.msk.bf16.mxu1 %vm2538_vm0, %v2537_v34 }
 0x3e6   :  { %2201 = vmatprep.subr.bf16.mxu1 %v2537_v34  ;;  %1601 = vmatpush1.bf16.msra.mxu0 %v2301_v35 }
 0x3e7   :  { %1602 = vmatprep.subr.bf16.mxu0 %v2306_v15 }
 0x3ea   :  { %1603 = vmatpush1.bf16.msra.mxu0 %v2304_v17 }
 0x3eb   :  { %1604 = vmatprep.subr.bf16.mxu0 %v2309_v44  ;;  %v2394_v44 = vld [vmem:[#allocation3] sm:$0xff] }
 0x3ec   :  { %2192 = vmatmul.mubr.msk.bf16.vlgmr.msra.gmra.mxu1 %vm446_vm3, %v1286_v41 }
 0x3ed   :  { %2203 = vmatprep.mubr.msk.bf16.mxu1 %vm2538_vm0, %v2537_v34 }
 0x3ee   :  { %1605 = vmatpush1.bf16.msra.mxu0 %v2307_v20 }
 0x3ef   :  { %1606 = vmatprep.subr.bf16.mxu0 %v2312_v3 }
 0x3f2   :  { %1607 = vmatpush1.bf16.msra.mxu0 %v2310_v21 }
 0x3f3   :  { %1608 = vmatprep.subr.bf16.mxu0 %v2315_v22 }
 0x3f6   :  { %1609 = vmatpush1.bf16.msra.mxu0 %v2313_v25 }
 0x402   :  { %v1418_v26 = vpop.xlane.xlu1 %1417 }
 0x403   :  { %2388 = vrcp.f32 %v1418_v26 }
 0x406   :  { %v1425_v51 = vpop.permute.xlu1 %1424 }
 0x407   :  { %v1430_v55 = vsel %vm473_vm2, %v1425_v51, 0  ;;  %v511_v57 = vpop.f32.mrf.mxu1 }
 0x408   :  { %2202 = vmatpush3.bf16.msra.mxu1 %v1430_v55  ;;  %v2023_v40 = vpack.c.bf16 %v511_v57, %v511_v57 }
 0x409   :  { %v2121_v60 = vpop.f32.mrf.mxu1 }
 0x40a   :  { %527 = vst.msk [vmem:[#allocation2] sm:$0xf] %vm526_vm4, %v2023_v40 }
 0x40b   :  { %v514_v1 = vpop.f32.mrf.mxu1 }
 0x40c   :  { %v2024_v58 = vpack.c.bf16 %v514_v1, %v514_v1 }
 0x40d   :  { %v2122_v10 = vpop.f32.mrf.mxu1 }
 0x40e   :  { %528 = vst.msk [vmem:[#allocation2 + $0x4] sm:$0xf] %vm526_vm4, %v2024_v58 }
 0x410   :  { %v2389_v34 = vpop.eup %2388 }
 0x411   :  { %v1422_v2 = vmul.f32 %v2389_v34, %v2829_v54 }
 0x413   :  { %v1423_v4 = vpack.c.bf16 %v1422_v2, %v1421_v63 }
 0x415   :  { %2204 = vmatmul.mubr.msk.bf16.vlgmr.msra.gmra.mxu1 %vm446_vm3, %v1423_v4 }
 0x457   :  { %v648_v43 = vpop.f32.mrf.mxu1 }
 0x458   :  { %v2025_v48 = vpack.c.bf16 %v648_v43, %v648_v43 }
 0x459   :  { %v2133_v54 = vpop.f32.mrf.mxu1 }
 0x45a   :  { %661 = vrot.lane.b32.xlu0 %v2025_v48, %s2541_s23 }
 0x45b   :  { %v651_v16 = vpop.f32.mrf.mxu1 }
 0x45c   :  { %v2026_v18 = vpack.c.bf16 %v651_v16, %v651_v16 }
 0x45d   :  { %v2134_v52 = vpop.f32.mrf.mxu1 }
 0x45e   :  { %663 = vrot.lane.b32.xlu1 %v2026_v18, %s2541_s23 }
 0x45f   :  { %v786_v61 = vpop.f32.mrf.mxu1 }
 0x460   :  { %v2027_v53 = vpack.c.bf16 %v786_v61, %v786_v61 }
 0x461   :  { %v2145_v50 = vpop.f32.mrf.mxu1 }
 0x462   :  { %799 = vrot.lane.b32.xlu0 %v2027_v53, %s2539_s21 }
 0x463   :  { %v789_v47 = vpop.f32.mrf.mxu1 }
 0x464   :  { %v2028_v56 = vpack.c.bf16 %v789_v47, %v789_v47  ;;  %v2395_v47 = vld [vmem:[#allocation3 + $0x8] sm:$0xff] }
 0x465   :  { %v2146_v24 = vpop.f32.mrf.mxu1 }
 0x466   :  { %801 = vrot.lane.b32.xlu1 %v2028_v56, %s2539_s21 }
 0x467   :  { %v924_v27 = vpop.f32.mrf.mxu1 }
 0x468   :  { %v2029_v7 = vpack.c.bf16 %v924_v27, %v924_v27 }
 0x469   :  { %v2157_v30 = vpop.f32.mrf.mxu1 }
 0x46a   :  { %937 = vrot.lane.b32.xlu0 %v2029_v7, %s2540_s22 }
 0x46b   :  { %v927_v32 = vpop.f32.mrf.mxu1 }
 0x46c   :  { %v2030_v33 = vpack.c.bf16 %v927_v32, %v927_v32 }
 0x46d   :  { %v2158_v38 = vpop.f32.mrf.mxu1 }
 0x46e   :  { %939 = vrot.lane.b32.xlu1 %v2030_v33, %s2540_s22  ;;  %v2396_v38 = vld [vmem:[#allocation3 + $0x10] sm:$0xff] }
 0x49c   :  { %v1058_v42 = vpop.f32.mrf.mxu1 }
 0x49d   :  { %v2031_v28 = vpack.c.bf16 %v1058_v42, %v1058_v42 }
 0x49e   :  { %v2169_v45 = vpop.f32.mrf.mxu1 }
 0x49f   :  { %1073 = vst.msk [vmem:[#allocation2 + $0x8] sm:$0xf] %vm526_vm4, %v2031_v28 }
 0x4a0   :  { %v1061_v31 = vpop.f32.mrf.mxu1 }
 0x4a1   :  { %v2032_v23 = vpack.c.bf16 %v1061_v31, %v1061_v31 }
 0x4a2   :  { %v2170_v46 = vpop.f32.mrf.mxu1 }
 0x4a3   :  { %1074 = vst.msk [vmem:[#allocation2 + $0xc] sm:$0xf] %vm526_vm4, %v2032_v23  ;;  %v2397_v23 = vld [vmem:[#allocation3 + $0x18] sm:$0xff] }
 0x4a4   :  { %v1192_v59 = vpop.f32.mrf.mxu1 }
 0x4a5   :  { %v2033_v6 = vpack.c.bf16 %v1192_v59, %v1192_v59 }
 0x4a6   :  { %v2181_v19 = vpop.f32.mrf.mxu1 }
 0x4a7   :  { %1205 = vrot.lane.b32.xlu0 %v2033_v6, %s2541_s23 }
 0x4a8   :  { %v1195_v49 = vpop.f32.mrf.mxu1 }
 0x4a9   :  { %v2034_v29 = vpack.c.bf16 %v1195_v49, %v1195_v49 }
 0x4aa   :  { %v2182_v41 = vpop.f32.mrf.mxu1 }
 0x4ab   :  { %1207 = vrot.lane.b32.xlu1 %v2034_v29, %s2541_s23 }
 0x4ac   :  { %v1329_v26 = vpop.f32.mrf.mxu1 }
 0x4ad   :  { %v2035_v51 = vpack.c.bf16 %v1329_v26, %v1329_v26 }
 0x4ae   :  { %v2193_v55 = vpop.f32.mrf.mxu1 }
 0x4af   :  { %1342 = vrot.lane.b32.xlu0 %v2035_v51, %s2539_s21 }
 0x4b0   :  { %v1332_v57 = vpop.f32.mrf.mxu1 }
 0x4b1   :  { %v2036_v40 = vpack.c.bf16 %v1332_v57, %v1332_v57 }
 0x4b2   :  { %v2194_v60 = vpop.f32.mrf.mxu1 }
 0x4b3   :  { %1344 = vrot.lane.b32.xlu1 %v2036_v40, %s2539_s21 }
 0x4cc   :  { %v662_v1 = vpop.permute.xlu0 %661 }
 0x4cd   :  { %668 = vst.msk [vmem:[#allocation2] sm:$0xf] %vm667_vm5, %v662_v1 }
 0x4d0   :  { %v664_v58 = vpop.permute.xlu1 %663 }
 0x4d1   :  { %669 = vst.msk [vmem:[#allocation2 + $0x4] sm:$0xf] %vm667_vm5, %v664_v58 }
 0x4d4   :  { %v800_v62 = vpop.permute.xlu0 %799 }
 0x4d5   :  { %806 = vst.msk [vmem:[#allocation2] sm:$0xf] %vm805_vm6, %v800_v62  ;;  %v1466_v10 = vpop.f32.mrf.mxu1 }
 0x4d6   :  { %v2037_v34 = vpack.c.bf16 %v1466_v10, %v1466_v10 }
 0x4d7   :  { %v2205_v63 = vpop.f32.mrf.mxu1 }
 0x4d8   :  { %v802_v2 = vpop.permute.xlu1 %801  ;;  %1479 = vrot.lane.b32.xlu0 %v2037_v34, %s2540_s22 }
 0x4d9   :  { %807 = vst.msk [vmem:[#allocation2 + $0x4] sm:$0xf] %vm805_vm6, %v802_v2  ;;  %v1469_v4 = vpop.f32.mrf.mxu1 }
 0x4da   :  { %v2038_v5 = vpack.c.bf16 %v1469_v4, %v1469_v4 }
 0x4db   :  { %v2206_v8 = vpop.f32.mrf.mxu1 }
 0x4dc   :  { %1481 = vrot.lane.b32.xlu1 %v2038_v5, %s2540_s22  ;;  %v938_v9 = vpop.permute.xlu0 %937  ;;  %v2318_v8 = vld [vmem:[#allocation9 + $0x164] ss:$24 sps:$4 sm:$0xff]  }
 0x4dd   :  { %944 = vst.msk [vmem:[#allocation2] sm:$0xf] %vm943_vm7, %v938_v9  ;;  %v2319_v9 = vld [vmem:[#allocation9 + $0x134] ss:$24 sps:$4 sm:$0xff]   ;;  %2207 = vmatprep.subr.bf16.mxu1 %v2318_v8 }
 0x4de   :  { %2208 = vmatpush3.bf16.msra.mxu1 %v2318_v8 }
 0x4df   :  { %2209 = vmatprep.subr.bf16.mxu1 %v2319_v9 }
 0x4e0   :  { %v940_v11 = vpop.permute.xlu1 %939 }
 0x4e1   :  { %945 = vst.msk [vmem:[#allocation2 + $0x4] sm:$0xf] %vm943_vm7, %v940_v11 }
 0x4e2   :  { %2210 = vmatpush3.bf16.msra.mxu1 %v2319_v9 }
 0x4e8   :  { %v2316_v12 = vld [vmem:[#allocation2] sm:$0xff]  }
 0x4e9   :  { %1627 = vmatmul.mubr.bf16.vlgmr.msra.gmra.mxu0 %v2316_v12  ;;  %v2320_v12 = vld [vmem:[#allocation9 + $0x104] ss:$24 sps:$4 sm:$0xff]  }
 0x4ea   :  { %1636 = vmatprep.mubr.bf16.mxu0 %v2536_v0  ;;  %v155_v0 = vld [vmem:[%s2961_s4 + $0x3] sm:$0x3]  ;;  %2211 = vmatprep.subr.bf16.mxu1 %v2320_v12 }
 0x4eb   :  { %v1495_v16 = vrot.slane %v155_v0, %v265_v37  ;;  %v1499_v17 = vrot.slane %v155_v0, %v269_v39  ;;  %2212 = vmatpush3.bf16.msra.mxu1 %v2320_v12 }
 0x519   :  { %v1206_v13 = vpop.permute.xlu0 %1205 }
 0x51a   :  { %1211 = vst.msk [vmem:[#allocation2 + $0x8] sm:$0xf] %vm667_vm5, %v1206_v13  ;;  %v2321_v13 = vld [vmem:[#allocation9 + $0xd4] ss:$24 sps:$4 sm:$0xff]  }
 0x51b   :  { %2213 = vmatprep.subr.bf16.mxu1 %v2321_v13 }
 0x51c   :  { %2214 = vmatpush3.bf16.msra.mxu1 %v2321_v13 }
 0x51d   :  { %v1208_v14 = vpop.permute.xlu1 %1207 }
 0x51e   :  { %1212 = vst.msk [vmem:[#allocation2 + $0xc] sm:$0xf] %vm667_vm5, %v1208_v14  ;;  %v2322_v14 = vld [vmem:[#allocation9 + $0xa4] ss:$24 sps:$4 sm:$0xff]  }
 0x51f   :  { %2215 = vmatprep.subr.bf16.mxu1 %v2322_v14 }
 0x520   :  { %2216 = vmatpush3.bf16.msra.mxu1 %v2322_v14 }
 0x521   :  { %v1343_v43 = vpop.permute.xlu0 %1342 }
 0x522   :  { %1348 = vst.msk [vmem:[#allocation2 + $0x8] sm:$0xf] %vm805_vm6, %v1343_v43 }
 0x525   :  { %v1345_v35 = vpop.permute.xlu1 %1344 }
 0x526   :  { %1349 = vst.msk [vmem:[#allocation2 + $0xc] sm:$0xf] %vm805_vm6, %v1345_v35  ;;  %v2323_v35 = vld [vmem:[#allocation9 + $0x74] ss:$24 sps:$4 sm:$0xff]  }
 0x527   :  { %2217 = vmatprep.subr.bf16.mxu1 %v2323_v35 }
 0x528   :  { %2218 = vmatpush3.bf16.msra.mxu1 %v2323_v35 }
 0x54a   :  { %v1480_v48 = vpop.permute.xlu0 %1479 }
 0x54b   :  { %1485 = vst.msk [vmem:[#allocation2 + $0x8] sm:$0xf] %vm943_vm7, %v1480_v48  ;;  %v2324_v48 = vld [vmem:[#allocation9 + $0x44] ss:$24 sps:$4 sm:$0xff]  }
 0x54c   :  { %2219 = vmatprep.subr.bf16.mxu1 %v2324_v48 }
 0x54d   :  { %2220 = vmatpush3.bf16.msra.mxu1 %v2324_v48 }
 0x54e   :  { %v1482_v54 = vpop.permute.xlu1 %1481 }
 0x54f   :  { %1486 = vst.msk [vmem:[#allocation2 + $0xc] sm:$0xf] %vm943_vm7, %v1482_v54 }
 0x556   :  { %v2317_v15 = vld [vmem:[#allocation2 + $0x8] sm:$0xff]  }
 0x557   :  { %1637 = vmatmul.mubr.bf16.gmra.mxu0 %v2317_v15 }
 0x5a9   :  { %v1628_v18 = vpop.f32.mrf.mxu0 }
 0x5aa   :  { %v1629_v52 = vadd.f32 %v1628_v18, %v1495_v16 }
 0x5ab   :  { %v1630_v20 = vpop.f32.mrf.mxu0 }
 0x5ac   :  { %v1647_v61 = vmul.f32 %v2394_v44, %v1629_v52  ;;  %v1631_v53 = vadd.f32 %v1630_v20, %v1499_v17 }
 0x5ad   :  { %v1632_v50 = vpop.f32.mrf.mxu0 }
 0x5ae   :  { %v1633_v21 = vadd.f32 %v1632_v50, %v1495_v16  ;;  %v2914_v22 = vadd.f32 %v1647_v61, %v1631_v53 }
 0x5af   :  { %v1634_v3 = vpop.f32.mrf.mxu0 }
 0x5b0   :  { %v1648_v56 = vmul.f32 %v2395_v47, %v1633_v21  ;;  %v1635_v24 = vadd.f32 %v1634_v3, %v1499_v17  ;;  %v1665_v37 = vmul.f32 %v2914_v22, %v2914_v22  ;;  %v2325_v21 = vld [vmem:[#allocation9 + $0x14] ss:$24 sps:$4 sm:$0xff]  }
 0x5b1   :  { %2221 = vmatprep.subr.bf16.mxu1 %v2325_v21 }
 0x5b2   :  { %v2916_v25 = vadd.f32 %v1648_v56, %v1635_v24  ;;  %2222 = vmatpush3.bf16.msra.mxu1 %v2325_v21 }
 0x5b4   :  { %v1655_v36 = vadd.f32 %v2916_v25, %v2914_v22  ;;  %v1666_v39 = vmul.f32 %v2916_v25, %v2916_v25 }
 0x5b6   :  { %1656 = vadd.xlane.f32.xlu0 %v1655_v36  ;;  %v1667_v27 = vadd.f32 %v1666_v39, %v1665_v37 }
 0x5b8   :  { %1668 = vadd.xlane.f32.xlu1 %v1667_v27 }
 0x617   :  { %v1638_v7 = vpop.f32.mrf.mxu0 }
 0x618   :  { %v1639_v30 = vadd.f32 %v1638_v7, %v1495_v16 }
 0x619   :  { %v1640_v32 = vpop.f32.mrf.mxu0 }
 0x61a   :  { %v1649_v42 = vmul.f32 %v2396_v38, %v1639_v30  ;;  %v1641_v28 = vadd.f32 %v1640_v32, %v1499_v17 }
 0x61b   :  { %v1642_v33 = vpop.f32.mrf.mxu0 }
 0x61c   :  { %v1643_v45 = vadd.f32 %v1642_v33, %v1495_v16  ;;  %v2924_v6 = vadd.f32 %v1649_v42, %v1641_v28 }
 0x61d   :  { %v1644_v31 = vpop.f32.mrf.mxu0 }
 0x61e   :  { %v1650_v46 = vmul.f32 %v2397_v23, %v1643_v45  ;;  %v1645_v59 = vadd.f32 %v1644_v31, %v1499_v17  ;;  %v1696_v41 = vmul.f32 %v2924_v6, %v2924_v6  ;;  %v2014_v31 = vld [vmem:[%s2961_s4 + $0x5] ss:$0 sm:$0xff]  ;;  %s2543_s4 = smov [#allocation11]  }
 0x61f   :  { %s1911_s21 = sshll.u32 %s2543_s4, 4  ;;  %s1912_s21 = int_to_ptr.vmem [resolvable:$true] %s1911_s21 }
 0x620   :  { %v2926_v19 = vadd.f32 %v1650_v46, %v1645_v59  ;;  %s2478_s22 = scalar_lea.vmem %s1912_s21, 512  ;;  %p2483_p7 = scmp.lt.s32.totalorder %s1912_s21, %s1912_s21 }
 0x621   :  { %p2479_p6 = scmp.ne.s32.totalorder %s1912_s21, %s2478_s22  ;;  %p2484_p8 = scmp.lt.s32.totalorder %s2478_s22, %s2478_s22 }
 0x622   :  { %v1686_v49 = vadd.f32 %v2926_v19, %v2924_v6  ;;  %v1697_v29 = vmul.f32 %v2926_v19, %v2926_v19 }
 0x623   :  { %p2485_p9 = por %p2484_p8, %p2483_p7 }
 0x624   :  { %1687 = vadd.xlane.f32.xlu0 %v1686_v49  ;;  %v1698_v26 = vadd.f32 %v1697_v29, %v1696_v41  ;;  %v1857_v29 = vld [vmem:[#allocation8] sm:$0xff] }
 0x625   :  { %p2486_p10 = pnand %p2485_p9, %p2479_p6 }
 0x628   :  { %1699 = vadd.xlane.f32.xlu0 %v1698_v26  ;;  %v1859_v26 = vld [vmem:[#allocation8 + $0x10] sm:$0xff] }
 0x63f   :  { %v1657_v51 = vpop.xlane.xlu0 %1656 }
 0x640   :  { %v1658_v55 = vrot.slane %v1657_v51, 4 }
 0x641   :  { %v1669_v57 = vpop.xlane.xlu1 %1668 }
 0x642   :  { %v1659_v40 = vadd.f32 %v1658_v55, %v1657_v51  ;;  %v1670_v60 = vrot.slane %v1669_v57, 4  ;;  %v1858_v55 = vld [vmem:[#allocation8 + $0x8] sm:$0xff] }
 0x644   :  { %v1660_v1 = vrot.slane %v1659_v40, 2  ;;  %v1671_v58 = vadd.f32 %v1670_v60, %v1669_v57 }
 0x646   :  { %v1672_v62 = vrot.slane %v1671_v58, 2  ;;  %v1661_v10 = vadd.f32 %v1660_v1, %v1659_v40  ;;  %v1860_v40 = vld [vmem:[#allocation8 + $0x18] sm:$0xff] }
 0x648   :  { %v1662_v34 = vrot.slane %v1661_v10, 1  ;;  %v1673_v63 = vadd.f32 %v1672_v62, %v1671_v58 }
 0x64a   :  { %v1663_v2 = vadd.f32 %v1662_v34, %v1661_v10  ;;  %v1674_v4 = vrot.slane %v1673_v63, 1 }
 0x64c   :  { %2227 = vpush %v1663_v2  ;;  %v1675_v5 = vadd.f32 %v1674_v4, %v1673_v63 }
 0x64e   :  { %2229 = vpush %v1675_v5 }
 0x67d   :  { %s2228_s28 = spop %2227 }
 0x67e   :  { %s2934_s29 = smul.f32 0.00048828125, %s2228_s28 }
 0x67f   :  { %s2230_s30 = spop %2229 }
 0x680   :  { %s1679_s7 = smul.f32 %s2934_s29, %s2934_s29  ;;  %v1722_v56 = vstv %s2934_s29 }
 0x681   :  { %s1678_s8 = smul.f32 0.00048828125, %s2230_s30  ;;  %v1740_v24 = vsub.f32 %v2914_v22, %v1722_v56  ;;  %v1741_v36 = vsub.f32 %v2916_v25, %v1722_v56 }
 0x683   :  { %s1680_s9 = ssub.f32 %s1678_s8, %s1679_s7 }
 0x685   :  { %s1681_s11 = smax.f32 %s2542_s10, %s1680_s9 }
 0x686   :  { %s1682_s12 = sadd.f32 1e-08, %s1681_s11 }
 0x688   :  { %v1683_v11 = vstv %s1682_s12 }
 0x689   :  { %2390 = vrsqrt.f32 %v1683_v11 }
 0x696   :  { %v2391_v43 = vpop.eup %2390 }
 0x697   :  { %2231 = vpush %v2391_v43 }
 0x6ad   :  { %v1688_v54 = vpop.xlane.xlu0 %1687 }
 0x6ae   :  { %v1689_v15 = vrot.slane %v1688_v54, 4 }
 0x6b0   :  { %v1690_v0 = vadd.f32 %v1689_v15, %v1688_v54 }
 0x6b1   :  { %v1700_v16 = vpop.xlane.xlu0 %1699 }
 0x6b2   :  { %v1691_v17 = vrot.slane %v1690_v0, 2  ;;  %v1701_v18 = vrot.slane %v1700_v16, 4 }
 0x6b4   :  { %v1702_v52 = vadd.f32 %v1701_v18, %v1700_v16  ;;  %v1692_v20 = vadd.f32 %v1691_v17, %v1690_v0 }
 0x6b6   :  { %v1703_v44 = vrot.slane %v1702_v52, 2  ;;  %v1693_v61 = vrot.slane %v1692_v20, 1 }
 0x6b8   :  { %v1694_v53 = vadd.f32 %v1693_v61, %v1692_v20  ;;  %v1704_v50 = vadd.f32 %v1703_v44, %v1702_v52 }
 0x6ba   :  { %2233 = vpush %v1694_v53  ;;  %v1705_v3 = vrot.slane %v1704_v50, 1 }
 0x6bc   :  { %v1706_v47 = vadd.f32 %v1705_v3, %v1704_v50 }
 0x6be   :  { %2235 = vpush %v1706_v47 }
 0x6c8   :  { %s2232_s1 = spop %2231 }
 0x6c9   :  { %v1724_v37 = vstv %s2232_s1 }
 0x6ca   :  { %v1744_v39 = vmul.f32 %v1740_v24, %v1724_v37  ;;  %v1745_v27 = vmul.f32 %v1741_v36, %v1724_v37 }
 0x6cc   :  { %v1748_v7 = vpack.c.bf16 %v1745_v27, %v1744_v39 }
 0x6ce   :  { %2223 = vmatprep.mubr.bf16.mxu1 %v1748_v7 }
 0x6eb   :  { %s2234_s13 = spop %2233 }
 0x6ec   :  { %s1708_s14 = smul.f32 0.00048828125, %s2234_s13 }
 0x6ee   :  { %s1710_s0 = smul.f32 %s1708_s14, %s1708_s14  ;;  %v1730_v22 = vstv %s1708_s14 }
 0x6ef   :  { %s2236_s15 = spop %2235  ;;  %v1742_v25 = vsub.f32 %v2924_v6, %v1730_v22  ;;  %v1743_v33 = vsub.f32 %v2926_v19, %v1730_v22 }
 0x6f0   :  { %s1709_s16 = smul.f32 0.00048828125, %s2236_s15 }
 0x6f2   :  { %s1711_s17 = ssub.f32 %s1709_s16, %s1710_s0 }
 0x6f4   :  { %s1712_s18 = smax.f32 %s2542_s10, %s1711_s17 }
 0x6f5   :  { %s1713_s2 = sadd.f32 1e-08, %s1712_s18 }
 0x6f7   :  { %v1714_v30 = vstv %s1713_s2 }
 0x6f8   :  { %2392 = vrsqrt.f32 %v1714_v30 }
 0x705   :  { %v2393_v32 = vpop.eup %2392 }
 0x706   :  { %2237 = vpush %v2393_v32 }
 0x737   :  { %s2238_s3 = spop %2237 }
 0x738   :  { %v1735_v38 = vstv %s2238_s3 }
 0x739   :  { %v1746_v42 = vmul.f32 %v1742_v25, %v1735_v38  ;;  %v1747_v28 = vmul.f32 %v1743_v33, %v1735_v38 }
 0x73b   :  { %v1749_v45 = vpack.c.bf16 %v1747_v28, %v1746_v42 }
 0x73d   :  { %2224 = vmatmul.mubr.bf16.vlgmr.msra.gmra.mxu1 %v1749_v45 }
 0x7fd   :  { %v2225_v23 = vpop.f32.mrf.mxu1 }
 0x7fe   :  { %v1847_v46 = vadd.f32 %v2225_v23, %v2014_v31 }
 0x7ff   :  { %v1838_v59 = vpop.f32.mrf.mxu1 }
 0x800   :  { %1855 = vst [vmem:[#allocation11 + $0x10] sm:$0xff] %v1847_v46  ;;  %v1839_v49 = vadd.f32 %v2014_v31, %v1838_v59  ;;  %v1863_v60 = vsub.f32 %v1847_v46, %v1859_v26 }
 0x801   :  { %v2226_v41 = vpop.f32.mrf.mxu1 }
 0x802   :  { %1853 = vst [vmem:[#allocation11] sm:$0xff] %v1839_v49  ;;  %v1850_v6 = vadd.f32 %v2226_v41, %v2014_v31  ;;  %v1861_v19 = vsub.f32 %v1839_v49, %v1857_v29  ;;  %v1867_v2 = vand.u32 2147483647, %v1863_v60  ;;  %v1884_v4 = vmul.f32 %v1863_v60, %v1863_v60 }
 0x803   :  { %v1841_v51 = vpop.f32.mrf.mxu1 }
 0x804   :  { %1856 = vst [vmem:[#allocation11 + $0x18] sm:$0xff] %v1850_v6  ;;  %v1842_v57 = vadd.f32 %v2014_v31, %v1841_v51  ;;  %v1865_v58 = vand.u32 2147483647, %v1861_v19  ;;  %v1882_v62 = vmul.f32 %v1861_v19, %v1861_v19  ;;  %v1864_v10 = vsub.f32 %v1850_v6, %v1860_v40 }
 0x806   :  { %1854 = vst [vmem:[#allocation11 + $0x8] sm:$0xff] %v1842_v57  ;;  %v1862_v1 = vsub.f32 %v1842_v57, %v1858_v55  ;;  %v1885_v9 = vmul.f32 %v1864_v10, %v1864_v10  ;;  %v1868_v12 = vand.u32 2147483647, %v1864_v10 }
 0x808   :  { %v1866_v34 = vand.u32 2147483647, %v1862_v1  ;;  %v1883_v63 = vmul.f32 %v1862_v1, %v1862_v1 }
 0x80a   :  { %v1886_v5 = vadd.f32 %v1883_v63, %v1882_v62  ;;  %v1869_v8 = vadd.f32 %v1866_v34, %v1865_v58 }
 0x80c   :  { %v1887_v11 = vadd.f32 %v1886_v5, %v1884_v4  ;;  %v1870_v13 = vadd.f32 %v1869_v8, %v1867_v2 }
 0x80e   :  { %v1888_v14 = vadd.f32 %v1887_v11, %v1885_v9  ;;  %v1871_v43 = vadd.f32 %v1870_v13, %v1868_v12 }
 0x810   :  { %1889 = vadd.xlane.f32.xlu0 %v1888_v14  ;;  %1872 = vadd.xlane.f32.xlu1 %v1871_v43 }
 0x811   :  { %2489 = shalt.err (!%p2486_p10)
}
 0x812   :  { %1917 = dma.vmem_to_hbm [thread:$0]  %s1912_s21, 512, %s2962_s5, [#allocation5], %s2530_s26, %s2530_s26, %s2531_s27   ;;  %vm1904_vm8 = vcmask 0  }
 0x813   :  { %s2544_s7 = smov [#allocation12]  }
 0x814   :  { %s1924_s8 = sshll.u32 %s2544_s7, 4  ;;  %s1925_s8 = int_to_ptr.vmem [resolvable:$true] %s1924_s8 }
 0x815   :  { %s2498_s10 = scalar_lea.vmem %s1925_s8, 16  ;;  %s2502_s11 = scalar_lea.vmem %s1925_s8, 32 }
 0x816   :  { %p2499_p11 = scmp.ne.s32.totalorder %s1925_s8, %s2498_s10  ;;  %p2503_p12 = scmp.lt.s32.totalorder %s1925_s8, %s1925_s8 }
 0x817   :  { %p2504_p13 = scmp.lt.s32.totalorder %s2502_s11, %s2498_s10 }
 0x819   :  { %p2505_p0 = por %p2504_p13, %p2503_p12 }
 0x81b   :  { %p2506_p1 = pnand %p2505_p0, %p2499_p11 }
 0x899   :  { %v1890_v35 = vpop.xlane.xlu0 %1889  ;;  %v1873_v48 = vpop.xlane.xlu1 %1872 }
 0x89a   :  { %v1891_v54 = vrot.slane %v1890_v35, 4  ;;  %v1874_v15 = vrot.slane %v1873_v48, 4 }
 0x89c   :  { %v1892_v0 = vadd.f32 %v1891_v54, %v1890_v35  ;;  %v1875_v16 = vadd.f32 %v1874_v15, %v1873_v48 }
 0x89e   :  { %v1893_v17 = vrot.slane %v1892_v0, 2  ;;  %v1876_v18 = vrot.slane %v1875_v16, 2 }
 0x8a0   :  { %v1894_v52 = vadd.f32 %v1893_v17, %v1892_v0  ;;  %v1877_v20 = vadd.f32 %v1876_v18, %v1875_v16 }
 0x8a2   :  { %v1878_v44 = vrot.slane %v1877_v20, 1  ;;  %v1895_v61 = vrot.slane %v1894_v52, 1 }
 0x8a4   :  { %v1879_v53 = vadd.f32 %v1878_v44, %v1877_v20  ;;  %v1896_v50 = vadd.f32 %v1895_v61, %v1894_v52 }
 0x8a6   :  { %2239 = vpush %v1879_v53 }
 0x8a7   :  { %2241 = vpush %v1896_v50 }
 0x8d7   :  { %s2240_s25 = spop %2239 }
 0x8d8   :  { %s1881_s28 = smul.f32 0.00024414063, %s2240_s25  ;;  %s2242_s29 = spop %2241 }
 0x8d9   :  { %s1898_s5 = smul.f32 0.00024414063, %s2242_s29 }
 0x8da   :  { %s1900_s27 = smul.f32 0.5, %s1881_s28 }
 0x8db   :  { %s1899_s26 = smul.f32 0.5, %s1898_s5 }
 0x8dd   :  { %s1901_s30 = smul.f32 0.5, %s1899_s26 }
 0x8df   :  { %s1902_s9 = sadd.f32 %s1901_s30, %s1900_s27 }
 0x8e1   :  { %v1903_v21 = vstv %s1902_s9 }
 0x8e2   :  { %1905 = vst.msk [vmem:[#allocation12] sm:$0x1] %vm1904_vm8, %v1903_v21 }
 0x8e3   :  { %2509 = shalt.err (!%p2506_p1)
}
 0x8e4   :  { %1927 = dma.vmem_to_hbm [thread:$0]  %s1925_s8, 16, %s2963_s6, [#allocation13]  }
 0x8e5   :  { %2524 = dma.done.wait [#allocation5], 512  }
 0x8e6   :  { %2525 = vsyncadd [#allocation5], 4294966784 }
 0x8e7   :  { %2526 = dma.done.wait [#allocation13], 16  }
 0x8e8   :  { %2527 = vsyncadd [#allocation13], 4294967280 }
 0x8e9   :  { %1934 = vsyncpa [#allocation4], 1 }
 0x8ea   :  { %1935 = vsyncpa [#allocation7], 1 }
 0x8eb   :  { %1936 = vsyncpa [#allocation10], 1 }
 0x8ec   :  { %1937 = vsyncpa [#allocation5], 1 }
 0x8ed   :  { %1938 = vsyncpa [#allocation13], 1 }

</bundles_post_ra>
